<compile_context>
chip_gen: v5e
topology: v5e:2x2
jax: 0.10.0
libtpu: 0.0.40
codegen_flags: <defaults>
</compile_context>

<pallas_src>
import jax
import jax.numpy as jnp
import numpy as np
from jax.experimental import pallas as pl
from jax.experimental.pallas import tpu as pltpu

DIM = 100        # self.dim = 100 (fixed by the module)
DPAD = 128       # lane-aligned embedding dim (D padded 100 -> 128)
N_FILT = 16      # out_channels of each conv branch


def _round_up(n, m):
    return ((n + m - 1) // m) * m


def _make_kernel(bt, Lp, H):
    """bt = batch tile, Lp = L + 4 (true padded length), H = round_up(Lp-2, 8)."""

    def kernel(x_ref, w1_ref, w2_ref, w3_ref, b1_ref, b2_ref, b3_ref,
               wo_ref, bo_ref, o_ref):
        x = x_ref[...]                                # (bt, Lp_big, DPAD) bf16

        def branch(w_ref, b_ref, kh, n_wslices):
            h_out = Lp - kh + 1                       # valid conv output rows
            # im2col: one fused matmul per branch (shifted slices built once).
            xcol = jnp.concatenate(
                [x[:, dh:dh + H, :] for dh in range(kh)], axis=-1)
            y = jnp.dot(xcol.reshape(bt * H, kh * DPAD), w_ref[...],
                        preferred_element_type=jnp.float32)
            y = y.reshape(bt, H, n_wslices * N_FILT)  # H % 8 == 0 -> clean reshape
            # Global max pool over the valid sequence positions (pre-bias).
            pooled = jnp.max(y[:, :h_out, :], axis=1)            # (bt, nws*16)
            res = pooled[:, :N_FILT]
            for j in range(1, n_wslices):              # max over conv width slices
                res = jnp.maximum(res, pooled[:, j * N_FILT:(j + 1) * N_FILT])
            # bias + ReLU commute with max (both monotone) -> apply on small tensor
            return jnp.maximum(res + b_ref[...], 0.0)            # (bt, 16) f32

        p1 = branch(w1_ref, b1_ref, kh=5, n_wslices=1)
        p2 = branch(w2_ref, b2_ref, kh=4, n_wslices=2)
        p3 = branch(w3_ref, b3_ref, kh=3, n_wslices=3)

        feat = jnp.concatenate([p1, p2, p3], axis=1)             # (bt, 48)
        out = jnp.dot(feat, wo_ref[...],
                      preferred_element_type=jnp.float32) + bo_ref[...]
        o_ref[...] = out.astype(o_ref.dtype)                     # (bt, n_class)

    return kernel


def _pick_b_tile(B, H, Lp_big):
    # Conservative per-element VMEM estimate: double-buffered bf16 x tile,
    # bf16 im2col temporaries for all three branches, f32 matmul outputs.
    per_elem = 2 * Lp_big * DPAD * 2                  # x tile (bf16, double buf)
    per_elem += H * DPAD * 2 * (5 + 4 + 3)            # im2col temporaries (bf16)
    per_elem += H * 3 * N_FILT * 4 * 3                # branch matmul outputs (f32)
    budget = 16 * 1024 * 1024   # fits default scoped VMEM on v5e/v6e/v7x
    bt = int(min(256, max(8, budget // max(per_elem, 1))))
    bt = min(bt, _round_up(B, 8))
    return max(8, (bt // 8) * 8)


def init_params(key, vocab_size, n_class):
    ks = jax.random.split(key, 9)
    return {
        "emb": jax.random.normal(ks[0], (vocab_size, DIM), jnp.float32),
        "w1": 0.1 * jax.random.normal(ks[1], (N_FILT, DIM, 5, 5), jnp.float32),
        "b1": 0.1 * jax.random.normal(ks[2], (N_FILT,), jnp.float32),
        "w2": 0.1 * jax.random.normal(ks[3], (N_FILT, DIM, 4, 4), jnp.float32),
        "b2": 0.1 * jax.random.normal(ks[4], (N_FILT,), jnp.float32),
        "w3": 0.1 * jax.random.normal(ks[5], (N_FILT, DIM, 3, 3), jnp.float32),
        "b3": 0.1 * jax.random.normal(ks[6], (N_FILT,), jnp.float32),
        "wo": 0.1 * jax.random.normal(ks[7], (3 * N_FILT, n_class), jnp.float32),
        "bo": 0.1 * jax.random.normal(ks[8], (n_class,), jnp.float32),
    }


def forward(index, params, n_class):
    # --- glue (plain JAX): embedding gather, padding, weight re-slicing -------
    x = params["emb"][index]                          # (B, L, D) f32
    B, L, D = x.shape
    Lp = L + 4                                        # conv padding=2 on each side
    H = _round_up(Lp - 2, 8)                          # common, 8-aligned row count
    Lp_big = H + 4                                    # so every shifted slice fits

    # pad seq (2 leading zeros for the conv, extra trailing zeros up to Lp_big)
    # and pad D -> 128 lanes; cast to bf16 for the MXU.
    x_pad = jnp.pad(x, ((0, 0), (2, Lp_big - 2 - L), (0, DPAD - D)))
    x_pad = x_pad.astype(jnp.bfloat16)

    bt = _pick_b_tile(B, H, Lp_big)
    n_blocks = pl.cdiv(B, bt)
    B_pad = n_blocks * bt
    if B_pad != B:
        x_pad = jnp.pad(x_pad, ((0, B_pad - B), (0, 0), (0, 0)))

    def eff(w, kh, n_wslices):
        # Conv2d(D, 16, k=(kh,kw), pad=2) on a W=1 input: output width slice j
        # only sees weight column (2 - j).  Reshape each to (kh*DPAD, 16) and
        # concatenate along output channels -> one fused matmul per branch.
        mats = []
        for j in range(n_wslices):
            wj = jnp.transpose(w[:, :, :, 2 - j], (2, 1, 0))     # (kh, D, 16)
            wj = jnp.pad(wj, ((0, 0), (0, DPAD - D), (0, 0)))    # (kh, DPAD, 16)
            mats.append(wj.reshape(kh * DPAD, N_FILT))
        return jnp.concatenate(mats, axis=-1).astype(jnp.bfloat16)

    w1_eff = eff(params["w1"], 5, 1)                  # (5*128, 16)
    w2_eff = eff(params["w2"], 4, 2)                  # (4*128, 32)
    w3_eff = eff(params["w3"], 3, 3)                  # (3*128, 48)
    b1 = params["b1"].reshape(1, N_FILT)
    b2 = params["b2"].reshape(1, N_FILT)
    b3 = params["b3"].reshape(1, N_FILT)
    wo = params["wo"]                                 # (48, n_class) f32
    bo = params["bo"].reshape(1, n_class)

    kernel = _make_kernel(bt, Lp, H)
    full2 = lambda a: pl.BlockSpec(a.shape, lambda b: (0, 0))

    out = pl.pallas_call(
        kernel,
        out_shape=jax.ShapeDtypeStruct((B_pad, n_class), jnp.float32),
        grid=(n_blocks,),
        in_specs=[
            pl.BlockSpec((bt, Lp_big, DPAD), lambda b: (b, 0, 0)),
            full2(w1_eff), full2(w2_eff), full2(w3_eff),
            full2(b1), full2(b2), full2(b3),
            full2(wo), full2(bo),
        ],
        out_specs=pl.BlockSpec((bt, n_class), lambda b: (b, 0)),
        compiler_params=pltpu.CompilerParams(
            dimension_semantics=("parallel",)),
    )(x_pad, w1_eff, w2_eff, w3_eff, b1, b2, b3, wo, bo)

    return {"pred": out[:B]}


def reference(index, params):
    """Pure-JAX reference mirroring the PyTorch forward (NCHW conv)."""
    x = params["emb"][index]                           # (B, L, D)
    x = jnp.transpose(x[..., None], (0, 2, 1, 3))      # (B, D, L, 1)  NCHW

    def branch(w, b):
        y = jax.lax.conv_general_dilated(
            x, w, window_strides=(1, 1), padding=((2, 2), (2, 2)),
            dimension_numbers=("NCHW", "OIHW", "NCHW"),
            precision=jax.lax.Precision.HIGHEST)
        y = jnp.maximum(y + b[None, :, None, None], 0.0)
        return jnp.max(y, axis=(2, 3))                  # global max pool

    feat = jnp.concatenate(
        [branch(params["w1"], params["b1"]),
         branch(params["w2"], params["b2"]),
         branch(params["w3"], params["b3"])], axis=1)   # (B, 48)
    return feat @ params["wo"] + params["bo"][None, :]


if __name__ == "__main__":
    key = jax.random.PRNGKey(0)
    vocab_size = 50       # input_dim
    n_class = 5
    B, L = 2, 12

    k_param, k_idx = jax.random.split(key)
    params = init_params(k_param, vocab_size, n_class)
    index = jax.random.randint(k_idx, (B, L), 0, vocab_size, dtype=jnp.int32)

    out = forward(index, params, n_class)["pred"]
    jax.block_until_ready(out)

    ref = reference(index, params)
    np.testing.assert_allclose(np.asarray(out), np.asarray(ref),
                               rtol=2e-2, atol=2e-2)
    print("KERNEL_OK")
</pallas_src>

<mosaic_0001>
module attributes {stable_mosaic.version = 11 : i64} {
  func.func @kernel(%arg0: i32, %arg1: memref<8x20x128xbf16, #tpu.memory_space<vmem>>, %arg2: memref<640x16xbf16, #tpu.memory_space<vmem>>, %arg3: memref<512x32xbf16, #tpu.memory_space<vmem>>, %arg4: memref<384x48xbf16, #tpu.memory_space<vmem>>, %arg5: memref<1x16xf32, #tpu.memory_space<vmem>>, %arg6: memref<1x16xf32, #tpu.memory_space<vmem>>, %arg7: memref<1x16xf32, #tpu.memory_space<vmem>>, %arg8: memref<48x5xf32, #tpu.memory_space<vmem>>, %arg9: memref<1x5xf32, #tpu.memory_space<vmem>>, %arg10: memref<8x5xf32, #tpu.memory_space<vmem>>) attributes {dimension_semantics = [#tpu.dimension_semantics<parallel>], iteration_bounds = array<i64: 1>, scalar_prefetch = 0 : i64, scratch_operands = 0 : i64, tpu.core_type = #tpu.core_type<tc>, window_params = [{transform_indices = @transform_0, window_bounds = array<i64: 8, 20, 128>}, {pipeline_mode = #tpu.pipeline_mode<synchronous>, transform_indices = @transform_1, window_bounds = array<i64: 640, 16>}, {pipeline_mode = #tpu.pipeline_mode<synchronous>, transform_indices = @transform_2, window_bounds = array<i64: 512, 32>}, {pipeline_mode = #tpu.pipeline_mode<synchronous>, transform_indices = @transform_3, window_bounds = array<i64: 384, 48>}, {pipeline_mode = #tpu.pipeline_mode<synchronous>, transform_indices = @transform_4, window_bounds = array<i64: 1, 16>}, {pipeline_mode = #tpu.pipeline_mode<synchronous>, transform_indices = @transform_5, window_bounds = array<i64: 1, 16>}, {pipeline_mode = #tpu.pipeline_mode<synchronous>, transform_indices = @transform_6, window_bounds = array<i64: 1, 16>}, {pipeline_mode = #tpu.pipeline_mode<synchronous>, transform_indices = @transform_7, window_bounds = array<i64: 48, 5>}, {pipeline_mode = #tpu.pipeline_mode<synchronous>, transform_indices = @transform_8, window_bounds = array<i64: 1, 5>}, {transform_indices = @transform_9, window_bounds = array<i64: 8, 5>}]} {
    %c0 = arith.constant 0 : index
    %c0_0 = arith.constant 0 : index
    %c0_1 = arith.constant 0 : index
    %0 = vector.load %arg1[%c0, %c0_0, %c0_1] : memref<8x20x128xbf16, #tpu.memory_space<vmem>>, vector<8x20x128xbf16>
    %1 = vector.extract_strided_slice %0 {offsets = [0, 0, 0], sizes = [8, 16, 128], strides = [1, 1, 1]} : vector<8x20x128xbf16> to vector<8x16x128xbf16>
    %2 = vector.extract_strided_slice %0 {offsets = [0, 1, 0], sizes = [8, 16, 128], strides = [1, 1, 1]} : vector<8x20x128xbf16> to vector<8x16x128xbf16>
    %3 = vector.extract_strided_slice %0 {offsets = [0, 2, 0], sizes = [8, 16, 128], strides = [1, 1, 1]} : vector<8x20x128xbf16> to vector<8x16x128xbf16>
    %4 = vector.extract_strided_slice %0 {offsets = [0, 3, 0], sizes = [8, 16, 128], strides = [1, 1, 1]} : vector<8x20x128xbf16> to vector<8x16x128xbf16>
    %5 = vector.extract_strided_slice %0 {offsets = [0, 4, 0], sizes = [8, 16, 128], strides = [1, 1, 1]} : vector<8x20x128xbf16> to vector<8x16x128xbf16>
    %6 = tpu.concatenate %1, %2, %3, %4, %5 in 2 : vector<8x16x128xbf16>, vector<8x16x128xbf16>, vector<8x16x128xbf16>, vector<8x16x128xbf16>, vector<8x16x128xbf16> -> vector<8x16x640xbf16>
    %7 = vector.shape_cast %6 : vector<8x16x640xbf16> to vector<128x640xbf16>
    %c0_2 = arith.constant 0 : index
    %c0_3 = arith.constant 0 : index
    %8 = vector.load %arg2[%c0_2, %c0_3] : memref<640x16xbf16, #tpu.memory_space<vmem>>, vector<640x16xbf16>
    %cst = arith.constant dense<0.000000e+00> : vector<128x16xf32>
    %9 = tpu.matmul %7, %8, %cst {dimension_numbers = #tpu.dot_dimension_numbers<[1], [0], [0], [1], [0, 0, 1, 1], [], []>} : vector<128x640xbf16>, vector<640x16xbf16>, vector<128x16xf32> -> vector<128x16xf32>
    %10 = vector.shape_cast %9 : vector<128x16xf32> to vector<8x16x16xf32>
    %11 = vector.extract_strided_slice %10 {offsets = [0, 0, 0], sizes = [8, 12, 16], strides = [1, 1, 1]} : vector<8x16x16xf32> to vector<8x12x16xf32>
    %cst_4 = arith.constant dense<0xFF800000> : vector<8x16xf32>
    %12 = vector.multi_reduction <maximumf>, %11, %cst_4 [1] : vector<8x12x16xf32> to vector<8x16xf32>
    %c0_5 = arith.constant 0 : index
    %c0_6 = arith.constant 0 : index
    %13 = vector.load %arg5[%c0_5, %c0_6] : memref<1x16xf32, #tpu.memory_space<vmem>>, vector<1x16xf32>
    %14 = vector.broadcast %13 : vector<1x16xf32> to vector<8x16xf32>
    %15 = arith.addf %12, %14 : vector<8x16xf32>
    %cst_7 = arith.constant 0.000000e+00 : f32
    %16 = vector.broadcast %cst_7 : f32 to vector<8x16xf32>
    %17 = arith.maximumf %15, %16 : vector<8x16xf32>
    %18 = vector.extract_strided_slice %0 {offsets = [0, 0, 0], sizes = [8, 16, 128], strides = [1, 1, 1]} : vector<8x20x128xbf16> to vector<8x16x128xbf16>
    %19 = vector.extract_strided_slice %0 {offsets = [0, 1, 0], sizes = [8, 16, 128], strides = [1, 1, 1]} : vector<8x20x128xbf16> to vector<8x16x128xbf16>
    %20 = vector.extract_strided_slice %0 {offsets = [0, 2, 0], sizes = [8, 16, 128], strides = [1, 1, 1]} : vector<8x20x128xbf16> to vector<8x16x128xbf16>
    %21 = vector.extract_strided_slice %0 {offsets = [0, 3, 0], sizes = [8, 16, 128], strides = [1, 1, 1]} : vector<8x20x128xbf16> to vector<8x16x128xbf16>
    %22 = tpu.concatenate %18, %19, %20, %21 in 2 : vector<8x16x128xbf16>, vector<8x16x128xbf16>, vector<8x16x128xbf16>, vector<8x16x128xbf16> -> vector<8x16x512xbf16>
    %23 = vector.shape_cast %22 : vector<8x16x512xbf16> to vector<128x512xbf16>
    %c0_8 = arith.constant 0 : index
    %c0_9 = arith.constant 0 : index
    %24 = vector.load %arg3[%c0_8, %c0_9] : memref<512x32xbf16, #tpu.memory_space<vmem>>, vector<512x32xbf16>
    %cst_10 = arith.constant dense<0.000000e+00> : vector<128x32xf32>
    %25 = tpu.matmul %23, %24, %cst_10 {dimension_numbers = #tpu.dot_dimension_numbers<[1], [0], [0], [1], [0, 0, 1, 1], [], []>} : vector<128x512xbf16>, vector<512x32xbf16>, vector<128x32xf32> -> vector<128x32xf32>
    %26 = vector.shape_cast %25 : vector<128x32xf32> to vector<8x16x32xf32>
    %27 = vector.extract_strided_slice %26 {offsets = [0, 0, 0], sizes = [8, 13, 32], strides = [1, 1, 1]} : vector<8x16x32xf32> to vector<8x13x32xf32>
    %cst_11 = arith.constant dense<0xFF800000> : vector<8x32xf32>
    %28 = vector.multi_reduction <maximumf>, %27, %cst_11 [1] : vector<8x13x32xf32> to vector<8x32xf32>
    %29 = vector.extract_strided_slice %28 {offsets = [0, 0], sizes = [8, 16], strides = [1, 1]} : vector<8x32xf32> to vector<8x16xf32>
    %30 = vector.extract_strided_slice %28 {offsets = [0, 16], sizes = [8, 16], strides = [1, 1]} : vector<8x32xf32> to vector<8x16xf32>
    %31 = arith.maximumf %29, %30 : vector<8x16xf32>
    %c0_12 = arith.constant 0 : index
    %c0_13 = arith.constant 0 : index
    %32 = vector.load %arg6[%c0_12, %c0_13] : memref<1x16xf32, #tpu.memory_space<vmem>>, vector<1x16xf32>
    %33 = vector.broadcast %32 : vector<1x16xf32> to vector<8x16xf32>
    %34 = arith.addf %31, %33 : vector<8x16xf32>
    %cst_14 = arith.constant 0.000000e+00 : f32
    %35 = vector.broadcast %cst_14 : f32 to vector<8x16xf32>
    %36 = arith.maximumf %34, %35 : vector<8x16xf32>
    %37 = vector.extract_strided_slice %0 {offsets = [0, 0, 0], sizes = [8, 16, 128], strides = [1, 1, 1]} : vector<8x20x128xbf16> to vector<8x16x128xbf16>
    %38 = vector.extract_strided_slice %0 {offsets = [0, 1, 0], sizes = [8, 16, 128], strides = [1, 1, 1]} : vector<8x20x128xbf16> to vector<8x16x128xbf16>
    %39 = vector.extract_strided_slice %0 {offsets = [0, 2, 0], sizes = [8, 16, 128], strides = [1, 1, 1]} : vector<8x20x128xbf16> to vector<8x16x128xbf16>
    %40 = tpu.concatenate %37, %38, %39 in 2 : vector<8x16x128xbf16>, vector<8x16x128xbf16>, vector<8x16x128xbf16> -> vector<8x16x384xbf16>
    %41 = vector.shape_cast %40 : vector<8x16x384xbf16> to vector<128x384xbf16>
    %c0_15 = arith.constant 0 : index
    %c0_16 = arith.constant 0 : index
    %42 = vector.load %arg4[%c0_15, %c0_16] : memref<384x48xbf16, #tpu.memory_space<vmem>>, vector<384x48xbf16>
    %cst_17 = arith.constant dense<0.000000e+00> : vector<128x48xf32>
    %43 = tpu.matmul %41, %42, %cst_17 {dimension_numbers = #tpu.dot_dimension_numbers<[1], [0], [0], [1], [0, 0, 1, 1], [], []>} : vector<128x384xbf16>, vector<384x48xbf16>, vector<128x48xf32> -> vector<128x48xf32>
    %44 = vector.shape_cast %43 : vector<128x48xf32> to vector<8x16x48xf32>
    %45 = vector.extract_strided_slice %44 {offsets = [0, 0, 0], sizes = [8, 14, 48], strides = [1, 1, 1]} : vector<8x16x48xf32> to vector<8x14x48xf32>
    %cst_18 = arith.constant dense<0xFF800000> : vector<8x48xf32>
    %46 = vector.multi_reduction <maximumf>, %45, %cst_18 [1] : vector<8x14x48xf32> to vector<8x48xf32>
    %47 = vector.extract_strided_slice %46 {offsets = [0, 0], sizes = [8, 16], strides = [1, 1]} : vector<8x48xf32> to vector<8x16xf32>
    %48 = vector.extract_strided_slice %46 {offsets = [0, 16], sizes = [8, 16], strides = [1, 1]} : vector<8x48xf32> to vector<8x16xf32>
    %49 = arith.maximumf %47, %48 : vector<8x16xf32>
    %50 = vector.extract_strided_slice %46 {offsets = [0, 32], sizes = [8, 16], strides = [1, 1]} : vector<8x48xf32> to vector<8x16xf32>
    %51 = arith.maximumf %49, %50 : vector<8x16xf32>
    %c0_19 = arith.constant 0 : index
    %c0_20 = arith.constant 0 : index
    %52 = vector.load %arg7[%c0_19, %c0_20] : memref<1x16xf32, #tpu.memory_space<vmem>>, vector<1x16xf32>
    %53 = vector.broadcast %52 : vector<1x16xf32> to vector<8x16xf32>
    %54 = arith.addf %51, %53 : vector<8x16xf32>
    %cst_21 = arith.constant 0.000000e+00 : f32
    %55 = vector.broadcast %cst_21 : f32 to vector<8x16xf32>
    %56 = arith.maximumf %54, %55 : vector<8x16xf32>
    %57 = tpu.concatenate %17, %36, %56 in 1 : vector<8x16xf32>, vector<8x16xf32>, vector<8x16xf32> -> vector<8x48xf32>
    %c0_22 = arith.constant 0 : index
    %c0_23 = arith.constant 0 : index
    %58 = vector.load %arg8[%c0_22, %c0_23] : memref<48x5xf32, #tpu.memory_space<vmem>>, vector<48x5xf32>
    %cst_24 = arith.constant dense<0.000000e+00> : vector<8x5xf32>
    %59 = tpu.matmul %57, %58, %cst_24 {dimension_numbers = #tpu.dot_dimension_numbers<[1], [0], [0], [1], [0, 0, 1, 1], [], []>} : vector<8x48xf32>, vector<48x5xf32>, vector<8x5xf32> -> vector<8x5xf32>
    %c0_25 = arith.constant 0 : index
    %c0_26 = arith.constant 0 : index
    %60 = vector.load %arg9[%c0_25, %c0_26] : memref<1x5xf32, #tpu.memory_space<vmem>>, vector<1x5xf32>
    %61 = vector.broadcast %60 : vector<1x5xf32> to vector<8x5xf32>
    %62 = arith.addf %59, %61 : vector<8x5xf32>
    %c0_27 = arith.constant 0 : index
    %c0_28 = arith.constant 0 : index
    %63 = vector.load %arg10[%c0_27, %c0_28] : memref<8x5xf32, #tpu.memory_space<vmem>>, vector<8x5xf32>
    tpu.vector_store %arg10[%c0_27, %c0_28], %62 {strides = array<i32>} : memref<8x5xf32, #tpu.memory_space<vmem>>, vector<8x5xf32>,
    return
  }
  func.func @transform_0(%arg0: i32) -> (i32, i32, i32) {
    %c0_i32 = arith.constant 0 : i32
    %c0_i32_0 = arith.constant 0 : i32
    %c0_i32_1 = arith.constant 0 : i32
    return %arg0, %c0_i32, %c0_i32_0 : i32, i32, i32
  }
  func.func @transform_1(%arg0: i32) -> (i32, i32) {
    %c0_i32 = arith.constant 0 : i32
    %c0_i32_0 = arith.constant 0 : i32
    %c0_i32_1 = arith.constant 0 : i32
    return %c0_i32, %c0_i32_0 : i32, i32
  }
  func.func @transform_2(%arg0: i32) -> (i32, i32) {
    %c0_i32 = arith.constant 0 : i32
    %c0_i32_0 = arith.constant 0 : i32
    %c0_i32_1 = arith.constant 0 : i32
    return %c0_i32, %c0_i32_0 : i32, i32
  }
  func.func @transform_3(%arg0: i32) -> (i32, i32) {
    %c0_i32 = arith.constant 0 : i32
    %c0_i32_0 = arith.constant 0 : i32
    %c0_i32_1 = arith.constant 0 : i32
    return %c0_i32, %c0_i32_0 : i32, i32
  }
  func.func @transform_4(%arg0: i32) -> (i32, i32) {
    %c0_i32 = arith.constant 0 : i32
    %c0_i32_0 = arith.constant 0 : i32
    %c0_i32_1 = arith.constant 0 : i32
    return %c0_i32, %c0_i32_0 : i32, i32
  }
  func.func @transform_5(%arg0: i32) -> (i32, i32) {
    %c0_i32 = arith.constant 0 : i32
    %c0_i32_0 = arith.constant 0 : i32
    %c0_i32_1 = arith.constant 0 : i32
    return %c0_i32, %c0_i32_0 : i32, i32
  }
  func.func @transform_6(%arg0: i32) -> (i32, i32) {
    %c0_i32 = arith.constant 0 : i32
    %c0_i32_0 = arith.constant 0 : i32
    %c0_i32_1 = arith.constant 0 : i32
    return %c0_i32, %c0_i32_0 : i32, i32
  }
  func.func @transform_7(%arg0: i32) -> (i32, i32) {
    %c0_i32 = arith.constant 0 : i32
    %c0_i32_0 = arith.constant 0 : i32
    %c0_i32_1 = arith.constant 0 : i32
    return %c0_i32, %c0_i32_0 : i32, i32
  }
  func.func @transform_8(%arg0: i32) -> (i32, i32) {
    %c0_i32 = arith.constant 0 : i32
    %c0_i32_0 = arith.constant 0 : i32
    %c0_i32_1 = arith.constant 0 : i32
    return %c0_i32, %c0_i32_0 : i32, i32
  }
  func.func @transform_9(%arg0: i32) -> (i32, i32) {
    %c0_i32 = arith.constant 0 : i32
    %c0_i32_0 = arith.constant 0 : i32
    return %arg0, %c0_i32 : i32, i32
  }
}

</mosaic_0001>

<bundles_post_ra>
// kernel: tpu_custom_call.1
= control target key start
LH: loop header
LB: loop body
LE: loop exit
PB: predicated region body
PF: predicated region fallthrough
CT: control target
= control target key end

     0   :  { %s3806_s0 = inlined_call_operand.vmem [shape: bf16[8,20,128], index: 0, kind: input, shape index: {}]   ;;  %s3807_s1 = inlined_call_operand.vmem [shape: bf16[640,16], index: 1, kind: input, shape index: {}]   ;;  %s3808_s2 = inlined_call_operand.vmem [shape: bf16[512,32], index: 2, kind: input, shape index: {}]   ;;  %s3809_s3 = inlined_call_operand.vmem [shape: bf16[384,48], index: 3, kind: input, shape index: {}]   ;;  %s3810_s4 = inlined_call_operand.vmem [shape: f32[1,16], index: 4, kind: input, shape index: {}]   ;;  %s3811_s5 = inlined_call_operand.vmem [shape: f32[1,16], index: 5, kind: input, shape index: {}]   ;;  %s3812_s6 = inlined_call_operand.vmem [shape: f32[1,16], index: 6, kind: input, shape index: {}]   ;;  %s3813_s7 = inlined_call_operand.vmem [shape: f32[48,5], index: 7, kind: input, shape index: {}]   ;;  %s3814_s8 = inlined_call_operand.vmem [shape: f32[1,5], index: 8, kind: input, shape index: {}]   ;;  %s3815_s9 = inlined_call_operand.hbm [shape: f32[8,5], index: 9, kind: output, shape index: {}]  }
   0x1   :  { %v2696_v0 = vld [vmem:[%s3807_s1 + $0x38] sm:$0xff]  ;;  %v2695_v4 = vld [vmem:[%s3807_s1 + $0x30] sm:$0xff]  ;;  %v2694_v8 = vld [vmem:[%s3807_s1 + $0x28] sm:$0xff] }
   0x2   :  { %v2704_v1 = vld [vmem:[%s3807_s1 + $0x78] sm:$0xff]  ;;  %701 = vmatpush.bf16.msra.mxu0 %v2696_v0  ;;  %v2703_v5 = vld [vmem:[%s3807_s1 + $0x70] sm:$0xff]  ;;  %v2702_v9 = vld [vmem:[%s3807_s1 + $0x68] sm:$0xff] }
   0x3   :  { %v2712_v2 = vld [vmem:[%s3807_s1 + $0xb8] sm:$0xff]  ;;  %750 = vmatpush.bf16.msra.mxu1 %v2704_v1  ;;  %v2711_v6 = vld [vmem:[%s3807_s1 + $0xb0] sm:$0xff]  ;;  %v2710_v10 = vld [vmem:[%s3807_s1 + $0xa8] sm:$0xff] }
   0x4   :  { %v2720_v3 = vld [vmem:[%s3807_s1 + $0xf8] sm:$0xff]  ;;  %799 = vmatpush.bf16.msra.mxu2 %v2712_v2  ;;  %v2719_v7 = vld [vmem:[%s3807_s1 + $0xf0] sm:$0xff]  ;;  %v2718_v11 = vld [vmem:[%s3807_s1 + $0xe8] sm:$0xff] }
   0x5   :  { %848 = vmatpush.bf16.msra.mxu3 %v2720_v3  ;;  %v2693_v12 = vld [vmem:[%s3807_s1 + $0x20] sm:$0xff]  ;;  %v35_v16 = vld [vmem:[%s3806_s0 + $0x8] sm:$0x3]  ;;  %v2692_v18 = vld [vmem:[%s3807_s1 + $0x18] sm:$0xff] }
   0x6   :  { %702 = vmatpush.bf16.msra.mxu0 %v2695_v4  ;;  %v2701_v13 = vld [vmem:[%s3807_s1 + $0x60] sm:$0xff]  ;;  %v113_v17 = vunpack.c.l.b16 %v35_v16  ;;  %v2700_v19 = vld [vmem:[%s3807_s1 + $0x58] sm:$0xff] }
   0x7   :  { %751 = vmatpush.bf16.msra.mxu1 %v2703_v5  ;;  %v2709_v14 = vld [vmem:[%s3807_s1 + $0xa0] sm:$0xff]  ;;  %v2708_v21 = vld [vmem:[%s3807_s1 + $0x98] sm:$0xff] }
   0x8   :  { %800 = vmatpush.bf16.msra.mxu2 %v2711_v6  ;;  %v2717_v15 = vld [vmem:[%s3807_s1 + $0xe0] sm:$0xff]  ;;  %v2716_v22 = vld [vmem:[%s3807_s1 + $0xd8] sm:$0xff]  ;;  %v2944_v23 = vpack.c.b16 %v113_v17, %v113_v17 }
   0x9   :  { %849 = vmatpush.bf16.msra.mxu3 %v2719_v7  ;;  %v2936_v20 = vld [vmem:[%s3806_s0] sm:$0xff] }
   0xa   :  { %703 = vmatpush.bf16.msra.mxu0 %v2694_v8 }
   0xb   :  { %752 = vmatpush.bf16.msra.mxu1 %v2702_v9 }
   0xc   :  { %801 = vmatpush.bf16.msra.mxu2 %v2710_v10 }
   0xd   :  { %850 = vmatpush.bf16.msra.mxu3 %v2718_v11 }
   0xe   :  { %704 = vmatpush.bf16.msra.mxu0 %v2693_v12 }
   0xf   :  { %753 = vmatpush.bf16.msra.mxu1 %v2701_v13 }
  0x10   :  { %802 = vmatpush.bf16.msra.mxu2 %v2709_v14 }
  0x11   :  { %851 = vmatpush.bf16.msra.mxu3 %v2717_v15 }
  0x12   :  { %14 = vsyncpa [#allocation3], 0  ;;  %705 = vmatpush.bf16.msra.mxu0 %v2692_v18  ;;  %v2691_v24 = vld [vmem:[%s3807_s1 + $0x10] sm:$0xff]  ;;  %v133_v26 = vshll.u32 %v2936_v20, 16  ;;  %v131_v29 = vshrl.u32 %v2936_v20, 16  ;;  %v138_v30 = vshll.u32 %v2944_v23, 16 }
  0x13   :  { %754 = vmatpush.bf16.msra.mxu1 %v2700_v19  ;;  %v2699_v25 = vld [vmem:[%s3807_s1 + $0x50] sm:$0xff]  ;;  %v271_v31 = vshrl.u32 %v2944_v23, 16  ;;  %v2690_v32 = vld [vmem:[%s3807_s1 + $0x8] sm:$0xff]  ;;  %v2689_v42 = vld [vmem:[%s3807_s1] sm:$0xff]  ;;  %vm129_vm0 = vsmask.f32 7424 }
  0x14   :  { %803 = vmatpush.bf16.msra.mxu2 %v2708_v21  ;;  %v2707_v27 = vld [vmem:[%s3807_s1 + $0x90] sm:$0xff]  ;;  %v2698_v33 = vld [vmem:[%s3807_s1 + $0x48] sm:$0xff]  ;;  %v135_v34 = vrot.slane %v133_v26, 1  ;;  %v268_v37 = vrot.slane %v131_v29, 1  ;;  %v269_v38 = vrot.slane %v133_v26, 2  ;;  %v274_v40 = vrot.slane %v138_v30, 2 }
  0x15   :  { %852 = vmatpush.bf16.msra.mxu3 %v2716_v22  ;;  %v2715_v28 = vld [vmem:[%s3807_s1 + $0xd0] sm:$0xff]  ;;  %v2706_v35 = vld [vmem:[%s3807_s1 + $0x88] sm:$0xff]  ;;  %v273_v39 = vrot.slane %v271_v31, 1  ;;  %v2697_v43 = vld [vmem:[%s3807_s1 + $0x40] sm:$0xff]  ;;  %v140_v45 = vrot.slane %v138_v30, 1  ;;  %v235_v46 = vrot.slane %v2936_v20, 1 }
  0x16   :  { %706 = vmatpush.bf16.msra.mxu0 %v2691_v24  ;;  %v2714_v36 = vld [vmem:[%s3807_s1 + $0xc8] sm:$0xff]  ;;  %v38_v41 = vld [vmem:[%s3806_s0 + $0x14] sm:$0x3]  ;;  %v136_v44 = vor.u32 %v135_v34, %v131_v29  ;;  %v2705_v47 = vld [vmem:[%s3807_s1 + $0x80] sm:$0xff]  ;;  %v236_v49 = vrot.slane %v2944_v23, 1  ;;  %v270_v50 = vor.u32 %v269_v38, %v268_v37  ;;  %vm234_vm1 = vcmask 1046528  }
  0x17   :  { %755 = vmatpush.bf16.msra.mxu1 %v2699_v25  ;;  %v2713_v48 = vld [vmem:[%s3807_s1 + $0xc0] sm:$0xff]  ;;  %v275_v51 = vor.u32 %v274_v40, %v273_v39  ;;  %v114_v52 = vunpack.c.l.b16 %v38_v41  ;;  %vm267_vm2 = vsmask.f32 6400  ;;  %v2744_v53 = vld [vmem:[%s3808_s2 + $0x78] sm:$0xff]  ;;  %v3003_v56 = vld [vmem:[%s3806_s0 + $0xc] sm:$0xff]  ;;  %vm348_vm3 = vcmask 1045504  }
  0x18   :  { %804 = vmatpush.bf16.msra.mxu2 %v2707_v27  ;;  %v2752_v54 = vld [vmem:[%s3808_s2 + $0xb8] sm:$0xff]  ;;  %v2998_v55 = vsel %vm129_vm0, %v136_v44, %v140_v45  ;;  %v3006_v57 = vsel %vm234_vm1, %v235_v46, %v236_v49  ;;  %v2743_v62 = vld [vmem:[%s3808_s2 + $0x70] sm:$0xff]  ;;  %v145_v0 = vshll.u32 %v3003_v56, 16  ;;  %v143_v1 = vshrl.u32 %v3003_v56, 16  ;;  %v2742_v6 = vld [vmem:[%s3808_s2 + $0x68] sm:$0xff]  ;;  %s2822_s21 = smov 96  }
  0x19   :  { %853 = vmatpush.bf16.msra.mxu3 %v2715_v28  ;;  %v3009_v58 = vsel %vm267_vm2, %v270_v50, %v275_v51  ;;  %v2736_v59 = vld [vmem:[%s3808_s2 + $0x38] sm:$0xff]  ;;  %v3014_v60 = vpack.c.b16 %v114_v52, %v114_v52  ;;  %v2751_v63 = vld [vmem:[%s3808_s2 + $0xb0] sm:$0xff]  ;;  %v2750_v7 = vld [vmem:[%s3808_s2 + $0xa8] sm:$0xff]  ;;  %v238_v17 = vrot.slane %v3003_v56, 1  ;;  %vm946_vm4 = vcmask 130048   ;;  %s2825_s17 = smov [#allocation2]  }
  0x1a   :  { %707 = vmatpush.bf16.msra.mxu0 %v2690_v32  ;;  %v2728_v61 = vld [vmem:[%s3807_s1 + $0x138] sm:$0xff]  ;;  %v2735_v4 = vld [vmem:[%s3808_s2 + $0x30] sm:$0xff]  ;;  %v147_v8 = vrot.slane %v145_v0, 1  ;;  %v277_v9 = vrot.slane %v143_v1, 1  ;;  %v278_v10 = vrot.slane %v145_v0, 2  ;;  %v2734_v13 = vld [vmem:[%s3808_s2 + $0x28] sm:$0xff] }
  0x1b   :  { %756 = vmatpush.bf16.msra.mxu1 %v2698_v33  ;;  %v150_v2 = vshll.u32 %v3014_v60, 16  ;;  %v280_v3 = vshrl.u32 %v3014_v60, 16  ;;  %v2727_v5 = vld [vmem:[%s3807_s1 + $0x130] sm:$0xff]  ;;  %v41_v14 = vld [vmem:[%s3806_s0 + $0x20] sm:$0x3]  ;;  %v239_v18 = vrot.slane %v3014_v60, 1 }
  0x1c   :  { %805 = vmatpush.bf16.msra.mxu2 %v2706_v35  ;;  %v148_v15 = vor.u32 %v147_v8, %v143_v1  ;;  %v279_v19 = vor.u32 %v278_v10, %v277_v9  ;;  %v115_v22 = vunpack.c.l.b16 %v41_v14  ;;  %v3059_v25 = vld [vmem:[%s3806_s0 + $0x18] sm:$0xff]  ;;  %v2726_v30 = vld [vmem:[%s3807_s1 + $0x128] sm:$0xff]  ;;  %v2741_v31 = vld [vmem:[%s3808_s2 + $0x60] sm:$0xff]  ;;  %vm948_vm5 = vcmask 125952   ;;  %s2253_s18 = sshll.u32 %s2825_s17, 4  ;;  %s2254_s18 = int_to_ptr.vmem [resolvable:$true] %s2253_s18 }
  0x1d   :  { %854 = vmatpush.bf16.msra.mxu3 %v2714_v36  ;;  %v282_v11 = vrot.slane %v280_v3, 1  ;;  %v283_v12 = vrot.slane %v150_v2, 2  ;;  %v152_v16 = vrot.slane %v150_v2, 1  ;;  %v3062_v26 = vsel %vm234_vm1, %v238_v17, %v239_v18  ;;  %v2749_v32 = vld [vmem:[%s3808_s2 + $0xa0] sm:$0xff]  ;;  %v2732_v3 = vld [vmem:[%s3808_s2 + $0x18] sm:$0xff]  ;;  %v3141_v18 = vld [vmem:[%s3806_s0 + $0x30] sm:$0xff] }
  0x1e   :  { %708 = vmatpush.bf16.msra.mxu0 %v2689_v42  ;;  %v3067_v28 = vpack.c.b16 %v115_v22, %v115_v22  ;;  %v157_v29 = vshll.u32 %v3059_v25, 16  ;;  %v155_v33 = vshrl.u32 %v3059_v25, 16  ;;  %v2733_v36 = vld [vmem:[%s3808_s2 + $0x20] sm:$0xff]  ;;  %v44_v42 = vld [vmem:[%s3806_s0 + $0x2c] sm:$0x3]  ;;  %v241_v45 = vrot.slane %v3059_v25, 1 }
  0x1f   :  { %757 = vmatpush.bf16.msra.mxu1 %v2697_v43  ;;  %v284_v21 = vor.u32 %v283_v12, %v282_v11  ;;  %v3054_v24 = vsel %vm129_vm0, %v148_v15, %v152_v16  ;;  %v116_v49 = vunpack.c.l.b16 %v44_v42  ;;  %v3100_v51 = vld [vmem:[%s3806_s0 + $0x24] sm:$0xff]  ;;  %v47_v9 = vld [vmem:[%s3806_s0 + $0x38] sm:$0x3]  ;;  %vm2140_vm6 = vcmask 1041409  }
  0x20   :  { %806 = vmatpush.bf16.msra.mxu2 %v2705_v47  ;;  %v162_v34 = vshll.u32 %v3067_v28, 16  ;;  %v289_v35 = vshrl.u32 %v3067_v28, 16  ;;  %v159_v37 = vrot.slane %v157_v29, 1  ;;  %v286_v38 = vrot.slane %v155_v33, 1  ;;  %v50_v42 = vld [vmem:[%s3806_s0 + $0x44] sm:$0x3] }
  0x21   :  { %855 = vmatpush.bf16.msra.mxu3 %v2713_v48  ;;  %709 = vmatmul.bf16.vlgmr.msra.gmra.mxu0 %v2936_v20  ;;  %v3065_v27 = vsel %vm267_vm2, %v279_v19, %v284_v21  ;;  %v287_v39 = vrot.slane %v157_v29, 2  ;;  %v242_v46 = vrot.slane %v3067_v28, 1  ;;  %v167_v0 = vshrl.u32 %v3100_v51, 16 }
  0x22   :  { %758 = vmatmul.bf16.vlgmr.msra.gmra.mxu1 %v2998_v55  ;;  %897 = vmatpush.bf16.msrb.mxu0 %v2728_v61  ;;  %v291_v40 = vrot.slane %v289_v35, 1  ;;  %v292_v41 = vrot.slane %v162_v34, 2  ;;  %v160_v43 = vor.u32 %v159_v37, %v155_v33  ;;  %v164_v44 = vrot.slane %v162_v34, 1  ;;  %v2725_v61 = vld [vmem:[%s3807_s1 + $0x120] sm:$0xff] }
  0x23   :  { %807 = vmatmul.bf16.vlgmr.msra.gmra.mxu2 %v3006_v57  ;;  %1296 = vmatpush.bf16.msrb.mxu1 %v2736_v59  ;;  %v288_v47 = vor.u32 %v287_v39, %v286_v38  ;;  %v3103_v52 = vsel %vm234_vm1, %v241_v45, %v242_v46  ;;  %v169_v59 = vshll.u32 %v3100_v51, 16  ;;  %v244_v12 = vrot.slane %v3100_v51, 1 }
  0x24   :  { %1345 = vmatpush.bf16.msrb.mxu2 %v2744_v53  ;;  %856 = vmatmul.bf16.vlgmr.msra.gmra.mxu3 %v3009_v58  ;;  %v293_v48 = vor.u32 %v292_v41, %v291_v40  ;;  %v3095_v50 = vsel %vm129_vm0, %v160_v43, %v164_v44  ;;  %v117_v16 = vunpack.c.l.b16 %v47_v9  ;;  %v181_v29 = vshll.u32 %v3141_v18, 16 }
  0x25   :  { %1394 = vmatpush.bf16.msrb.mxu3 %v2752_v54  ;;  %v3108_v54 = vpack.c.b16 %v116_v49, %v116_v49  ;;  %v179_v33 = vshrl.u32 %v3141_v18, 16  ;;  %v247_v45 = vrot.slane %v3141_v18, 1  ;;  %v118_v49 = vunpack.c.l.b16 %v50_v42  ;;  %v2745_v42 = vld [vmem:[%s3808_s2 + $0x80] sm:$0xff] }
  0x26   :  { %898 = vmatpush.bf16.msrb.mxu0 %v2727_v5  ;;  %v3106_v53 = vsel %vm267_vm2, %v288_v47, %v293_v48  ;;  %v295_v5 = vrot.slane %v167_v0, 1  ;;  %v3149_v22 = vpack.c.b16 %v117_v16, %v117_v16  ;;  %v183_v37 = vrot.slane %v181_v29, 1 }
  0x27   :  { %1297 = vmatpush.bf16.msrb.mxu1 %v2735_v4  ;;  %v174_v1 = vshll.u32 %v3108_v54, 16  ;;  %v298_v2 = vshrl.u32 %v3108_v54, 16  ;;  %v171_v4 = vrot.slane %v169_v59, 1  ;;  %v304_v38 = vrot.slane %v179_v33, 1 }
  0x28   :  { %1346 = vmatpush.bf16.msrb.mxu2 %v2743_v62  ;;  %v2740_v62 = vld [vmem:[%s3808_s2 + $0x58] sm:$0xff]  ;;  %v186_v34 = vshll.u32 %v3149_v22, 16  ;;  %v307_v35 = vshrl.u32 %v3149_v22, 16  ;;  %v305_v39 = vrot.slane %v181_v29, 2  ;;  %v184_v43 = vor.u32 %v183_v37, %v179_v33 }
  0x29   :  { %1395 = vmatpush.bf16.msrb.mxu3 %v2751_v63  ;;  %v2748_v63 = vld [vmem:[%s3808_s2 + $0x98] sm:$0xff]  ;;  %v301_v8 = vrot.slane %v174_v1, 2  ;;  %v172_v10 = vor.u32 %v171_v4, %v167_v0  ;;  %v176_v11 = vrot.slane %v174_v1, 1  ;;  %v248_v46 = vrot.slane %v3149_v22, 1  ;;  %v2746_v4 = vld [vmem:[%s3808_s2 + $0x88] sm:$0xff] }
  0x2a   :  { %899 = vmatpush.bf16.msrb.mxu0 %v2726_v30  ;;  %v2724_v30 = vld [vmem:[%s3807_s1 + $0x118] sm:$0xff]  ;;  %v309_v40 = vrot.slane %v307_v35, 1  ;;  %v310_v41 = vrot.slane %v186_v34, 2  ;;  %v188_v44 = vrot.slane %v186_v34, 1  ;;  %v306_v47 = vor.u32 %v305_v39, %v304_v38  ;;  %v3223_v35 = vld [vmem:[%s3806_s0 + $0x48] sm:$0xff] }
  0x2b   :  { %1298 = vmatpush.bf16.msrb.mxu1 %v2734_v13  ;;  %v245_v13 = vrot.slane %v3108_v54, 1  ;;  %v3136_v17 = vsel %vm129_vm0, %v172_v10, %v176_v11  ;;  %v3190_v0 = vpack.c.b16 %v118_v49, %v118_v49  ;;  %v205_v39 = vshll.u32 %v3223_v35, 16 }
  0x2c   :  { %1347 = vmatpush.bf16.msrb.mxu2 %v2742_v6  ;;  %v296_v6 = vrot.slane %v169_v59, 2  ;;  %v311_v48 = vor.u32 %v310_v41, %v309_v40  ;;  %v3177_v59 = vsel %vm129_vm0, %v184_v43, %v188_v44  ;;  %v2722_v40 = vld [vmem:[%s3807_s1 + $0x108] sm:$0xff]  ;;  %v2737_v41 = vld [vmem:[%s3808_s2 + $0x40] sm:$0xff]  ;;  %v203_v43 = vshrl.u32 %v3223_v35, 16 }
  0x2d   :  { %1396 = vmatpush.bf16.msrb.mxu3 %v2750_v7  ;;  %v300_v7 = vrot.slane %v298_v2, 1  ;;  %v3144_v19 = vsel %vm234_vm1, %v244_v12, %v245_v13  ;;  %v2723_v2 = vld [vmem:[%s3807_s1 + $0x110] sm:$0xff]  ;;  %v323_v49 = vrot.slane %v205_v39, 2  ;;  %vm2143_vm7 = vcmask 1042434  }
  0x2e   :  { %900 = vmatpush.bf16.msrb.mxu0 %v2725_v61  ;;  %v297_v14 = vor.u32 %v296_v6, %v295_v5  ;;  %v3182_v61 = vld [vmem:[%s3806_s0 + $0x3c] sm:$0xff]  ;;  %v198_v6 = vshll.u32 %v3190_v0, 16  ;;  %vm2146_vm8 = vcmask 1043459   ;;  %vm2149_vm9 = vcmask 1044484  }
  0x2f   :  { %1299 = vmatpush.bf16.msrb.mxu1 %v2733_v36  ;;  %v302_v15 = vor.u32 %v301_v8, %v300_v7  ;;  %v2731_v36 = vld [vmem:[%s3808_s2 + $0x10] sm:$0xff]  ;;  %v193_v1 = vshll.u32 %v3182_v61, 16  ;;  %v191_v5 = vshrl.u32 %v3182_v61, 16  ;;  %v316_v7 = vshrl.u32 %v3190_v0, 16  ;;  %v2730_v8 = vld [vmem:[%s3808_s2 + $0x8] sm:$0xff] }
  0x30   :  { %1348 = vmatpush.bf16.msrb.mxu2 %v2741_v31  ;;  %v2739_v31 = vld [vmem:[%s3808_s2 + $0x50] sm:$0xff]  ;;  %v319_v13 = vrot.slane %v198_v6, 2  ;;  %v200_v16 = vrot.slane %v198_v6, 1  ;;  %v250_v29 = vrot.slane %v3182_v61, 1  ;;  %v253_v6 = vrot.slane %v3223_v35, 1 }
  0x31   :  { %714 = vmatmul.bf16.gmra.mxu0 %v3003_v56  ;;  %1397 = vmatpush.bf16.msrb.mxu3 %v2749_v32  ;;  %v3147_v21 = vsel %vm267_vm2, %v297_v14, %v302_v15  ;;  %v2747_v32 = vld [vmem:[%s3808_s2 + $0x90] sm:$0xff]  ;;  %v195_v9 = vrot.slane %v193_v1, 1  ;;  %v313_v10 = vrot.slane %v191_v5, 1  ;;  %v314_v11 = vrot.slane %v193_v1, 2 }
  0x32   :  { %763 = vmatmul.bf16.gmra.mxu1 %v3054_v24  ;;  %901 = vmatpush.bf16.msrb.mxu0 %v2724_v30  ;;  %v318_v12 = vrot.slane %v316_v7, 1  ;;  %v53_v14 = vld [vmem:[%s3806_s0 + $0x50] sm:$0x3]  ;;  %v251_v30 = vrot.slane %v3190_v0, 1  ;;  %vm2152_vm10 = vcmask 1045509   ;;  %vm2155_vm11 = vcmask 1046534  }
  0x33   :  { %812 = vmatmul.bf16.gmra.mxu2 %v3062_v26  ;;  %1300 = vmatpush.bf16.msrb.mxu1 %v2732_v3  ;;  %v2738_v3 = vld [vmem:[%s3808_s2 + $0x48] sm:$0xff]  ;;  %v196_v15 = vor.u32 %v195_v9, %v191_v5  ;;  %v119_v33 = vunpack.c.l.b16 %v53_v14  ;;  %vm1492_vm12 = vcmask 261120   ;;  %vm1494_vm13 = vcmask 258048  }
  0x34   :  { %861 = vmatmul.bf16.gmra.mxu3 %v3065_v27  ;;  %1349 = vmatpush.bf16.msrb.mxu2 %v2740_v62  ;;  %v3185_v62 = vsel %vm234_vm1, %v247_v45, %v248_v46  ;;  %v2729_v46 = vld [vmem:[%s3808_s2] sm:$0xff]  ;;  %vm2158_vm14 = vcmask 1047559   ;;  %vm1965_vm15 = vcmask 392192  }
  0x35   :  { %1398 = vmatpush.bf16.msrb.mxu3 %v2748_v63  ;;  %v3188_v63 = vsel %vm267_vm2, %v306_v47, %v311_v48  ;;  %v3218_v34 = vsel %vm129_vm0, %v196_v15, %v200_v16  ;;  %v3231_v38 = vpack.c.b16 %v119_v33, %v119_v33  ;;  %v207_v47 = vrot.slane %v205_v39, 1 }
  0x36   :  { %902 = vmatpush.bf16.msrb.mxu0 %v2723_v2  ;;  %v322_v48 = vrot.slane %v203_v43, 1 }
  0x37   :  { %1301 = vmatpush.bf16.msrb.mxu1 %v2731_v36  ;;  %v3226_v36 = vsel %vm234_vm1, %v250_v29, %v251_v30  ;;  %v210_v44 = vshll.u32 %v3231_v38, 16  ;;  %v325_v45 = vshrl.u32 %v3231_v38, 16  ;;  %v254_v7 = vrot.slane %v3231_v38, 1  ;;  %v2776_v30 = vld [vmem:[%s3809_s3 + $0x78] sm:$0xff] }
  0x38   :  { %1350 = vmatpush.bf16.msrb.mxu2 %v2739_v31  ;;  %v315_v31 = vor.u32 %v314_v11, %v313_v10  ;;  %v2721_v11 = vld [vmem:[%s3807_s1 + $0x100] sm:$0xff] }
  0x39   :  { %1399 = vmatpush.bf16.msrb.mxu3 %v2747_v32  ;;  %v320_v32 = vor.u32 %v319_v13, %v318_v12  ;;  %v327_v1 = vrot.slane %v325_v45, 1  ;;  %v328_v2 = vrot.slane %v210_v44, 2  ;;  %v212_v5 = vrot.slane %v210_v44, 1  ;;  %v3267_v13 = vld [vmem:[%s3806_s0 + $0x54] sm:$0xff] }
  0x3a   :  { %903 = vmatpush.bf16.msrb.mxu0 %v2722_v40  ;;  %v3270_v14 = vsel %vm234_vm1, %v253_v6, %v254_v7  ;;  %v217_v29 = vshll.u32 %v3267_v13, 16  ;;  %v2768_v45 = vld [vmem:[%s3809_s3 + $0x38] sm:$0xff]  ;;  %v2775_v7 = vld [vmem:[%s3809_s3 + $0x70] sm:$0xff] }
  0x3b   :  { %1302 = vmatpush.bf16.msrb.mxu1 %v2730_v8  ;;  %v3229_v37 = vsel %vm267_vm2, %v315_v31, %v320_v32  ;;  %v324_v8 = vor.u32 %v323_v49, %v322_v48  ;;  %v329_v9 = vor.u32 %v328_v2, %v327_v1  ;;  %v2784_v31 = vld [vmem:[%s3809_s3 + $0xb8] sm:$0xff]  ;;  %v215_v32 = vshrl.u32 %v3267_v13, 16 }
  0x3c   :  { %1351 = vmatpush.bf16.msrb.mxu2 %v2738_v3  ;;  %v56_v3 = vld [vmem:[%s3806_s0 + $0x5c] sm:$0x3]  ;;  %v219_v40 = vrot.slane %v217_v29, 1  ;;  %v256_v48 = vrot.slane %v3267_v13, 1 }
  0x3d   :  { %1400 = vmatpush.bf16.msrb.mxu3 %v2746_v4  ;;  %v208_v4 = vor.u32 %v207_v47, %v203_v43  ;;  %v120_v10 = vunpack.c.l.b16 %v56_v3  ;;  %v3273_v15 = vsel %vm267_vm2, %v324_v8, %v329_v9  ;;  %v2760_v6 = vld [vmem:[%s3808_s2 + $0xf8] sm:$0xff]  ;;  %v2783_v8 = vld [vmem:[%s3809_s3 + $0xb0] sm:$0xff] }
  0x3e   :  { %904 = vmatpush.bf16.msrb.mxu0 %v2721_v11  ;;  %v2767_v9 = vld [vmem:[%s3809_s3 + $0x30] sm:$0xff]  ;;  %v350_v11 = vrot.slane %v2944_v23, 2  ;;  %v2774_v23 = vld [vmem:[%s3809_s3 + $0x68] sm:$0xff] }
  0x3f   :  { %1303 = vmatpush.bf16.msrb.mxu1 %v2729_v46  ;;  %v3262_v12 = vsel %vm129_vm0, %v208_v4, %v212_v5  ;;  %v3275_v16 = vpack.c.b16 %v120_v10, %v120_v10  ;;  %v220_v46 = vor.u32 %v219_v40, %v215_v32  ;;  %v349_v10 = vrot.slane %v2936_v20, 2 }
  0x40   :  { %1352 = vmatpush.bf16.msrb.mxu2 %v2737_v41  ;;  %v331_v41 = vrot.slane %v215_v32, 1 }
  0x41   :  { %719 = vmatmul.bf16.gmra.mxu0 %v3059_v25  ;;  %1401 = vmatpush.bf16.msrb.mxu3 %v2745_v42  ;;  %v222_v33 = vshll.u32 %v3275_v16, 16  ;;  %v334_v39 = vshrl.u32 %v3275_v16, 16  ;;  %v332_v42 = vrot.slane %v217_v29, 2  ;;  %v257_v49 = vrot.slane %v3275_v16, 1 }
  0x42   :  { %768 = vmatmul.bf16.gmra.mxu1 %v3095_v50  ;;  %1443 = vmatpush.bf16.msra.mxu0 %v2760_v6 }
  0x43   :  { %817 = vmatmul.bf16.gmra.mxu2 %v3103_v52  ;;  %v336_v43 = vrot.slane %v334_v39, 1  ;;  %v337_v44 = vrot.slane %v222_v33, 2  ;;  %v224_v47 = vrot.slane %v222_v33, 1  ;;  %1818 = vmatpush.bf16.msra.mxu1 %v2768_v45  ;;  %v333_v1 = vor.u32 %v332_v42, %v331_v41  ;;  %v2759_v33 = vld [vmem:[%s3808_s2 + $0xf0] sm:$0xff]  ;;  %v2782_v39 = vld [vmem:[%s3809_s3 + $0xa8] sm:$0xff] }
  0x44   :  { %866 = vmatmul.bf16.gmra.mxu3 %v3106_v53  ;;  %1867 = vmatpush.bf16.msra.mxu2 %v2776_v30  ;;  %v3300_v4 = vsel %vm234_vm1, %v256_v48, %v257_v49  ;;  %v353_v48 = vrot.slane %v3014_v60, 2  ;;  %v2758_v60 = vld [vmem:[%s3808_s2 + $0xe8] sm:$0xff]  ;;  %vm2246_vm1 = vcmask 39936  }
  0x45   :  { %1916 = vmatpush.bf16.msra.mxu3 %v2784_v31  ;;  %v338_v2 = vor.u32 %v337_v44, %v336_v43  ;;  %v3297_v3 = vsel %vm129_vm0, %v220_v46, %v224_v47  ;;  %v351_v31 = vsel %vm348_vm3, %v349_v10, %v350_v11  ;;  %v2766_v46 = vld [vmem:[%s3809_s3 + $0x28] sm:$0xff]  ;;  %v352_v47 = vrot.slane %v3003_v56, 2  ;;  %v2773_v11 = vld [vmem:[%s3809_s3 + $0x60] sm:$0xff] }
  0x46   :  { %1444 = vmatpush.bf16.msra.mxu0 %v2759_v33  ;;  %vm1967_vm0 = vcmask 390144  }
  0x47   :  { %v3303_v5 = vsel %vm267_vm2, %v333_v1, %v338_v2  ;;  %1819 = vmatpush.bf16.msra.mxu1 %v2767_v9 }
  0x48   :  { %1868 = vmatpush.bf16.msra.mxu2 %v2775_v7 }
  0x49   :  { %1917 = vmatpush.bf16.msra.mxu3 %v2783_v8  ;;  %v354_v8 = vsel %vm348_vm3, %v352_v47, %v353_v48 }
  0x4a   :  { %1445 = vmatpush.bf16.msra.mxu0 %v2758_v60 }
  0x4b   :  { %1820 = vmatpush.bf16.msra.mxu1 %v2766_v46 }
  0x4c   :  { %1869 = vmatpush.bf16.msra.mxu2 %v2774_v23 }
  0x4d   :  { %1918 = vmatpush.bf16.msra.mxu3 %v2782_v39 }
  0x50   :  { %1870 = vmatpush.bf16.msra.mxu2 %v2773_v11 }
  0x51   :  { %724 = vmatmul.bf16.gmra.mxu0 %v3100_v51 }
  0x52   :  { %773 = vmatmul.bf16.gmra.mxu1 %v3136_v17 }
  0x53   :  { %822 = vmatmul.bf16.gmra.mxu2 %v3144_v19 }
  0x54   :  { %871 = vmatmul.bf16.gmra.mxu3 %v3147_v21 }
  0x61   :  { %729 = vmatmul.bf16.gmra.mxu0 %v3141_v18 }
  0x62   :  { %778 = vmatmul.bf16.gmra.mxu1 %v3177_v59 }
  0x63   :  { %827 = vmatmul.bf16.gmra.mxu2 %v3185_v62 }
  0x64   :  { %876 = vmatmul.bf16.gmra.mxu3 %v3188_v63 }
  0x71   :  { %734 = vmatmul.bf16.gmra.mxu0 %v3182_v61 }
  0x72   :  { %783 = vmatmul.bf16.gmra.mxu1 %v3218_v34 }
  0x73   :  { %832 = vmatmul.bf16.gmra.mxu2 %v3226_v36 }
  0x74   :  { %881 = vmatmul.bf16.gmra.mxu3 %v3229_v37 }
  0x81   :  { %739 = vmatmul.bf16.gmra.mxu0 %v3223_v35 }
  0x82   :  { %788 = vmatmul.bf16.gmra.mxu1 %v3262_v12 }
  0x83   :  { %837 = vmatmul.bf16.gmra.mxu2 %v3270_v14 }
  0x84   :  { %886 = vmatmul.bf16.gmra.mxu3 %v3273_v15 }
  0x91   :  { %744 = vmatmul.bf16.gmra.mxu0 %v3267_v13 }
  0x92   :  { %793 = vmatmul.bf16.gmra.mxu1 %v3297_v3 }
  0x93   :  { %842 = vmatmul.bf16.gmra.mxu2 %v3300_v4 }
  0x94   :  { %891 = vmatmul.bf16.gmra.mxu3 %v3303_v5 }
  0x9e   :  { %v710_v29 = vpop.f32.mrf.mxu0 }
  0x9f   :  { %v759_v30 = vpop.f32.mrf.mxu1 }
  0xa0   :  { %v760_v32 = vadd.f32 %v759_v30, %v710_v29  ;;  %v2781_v29 = vld [vmem:[%s3809_s3 + $0xa0] sm:$0xff] }
  0xa1   :  { %905 = vmatmul.bf16.vlgmr.msrb.gmra.mxu0 %v351_v31  ;;  %1919 = vmatpush.bf16.msra.mxu3 %v2781_v29 }
  0xa2   :  { %1304 = vmatmul.bf16.vlgmr.msrb.gmra.mxu1 %v2936_v20 }
  0xa3   :  { %1353 = vmatmul.bf16.vlgmr.msrb.gmra.mxu2 %v2998_v55 }
  0xa4   :  { %1402 = vmatmul.bf16.vlgmr.msrb.gmra.mxu3 %v3006_v57 }
  0xa6   :  { %v808_v40 = vpop.f32.mrf.mxu2  ;;  %v712_v42 = vpop.f32.mrf.mxu0 }
  0xa7   :  { %v857_v20 = vpop.f32.mrf.mxu3  ;;  %v809_v41 = vadd.f32 %v808_v40, %v760_v32  ;;  %v761_v43 = vpop.f32.mrf.mxu1 }
  0xa8   :  { %v762_v44 = vadd.f32 %v761_v43, %v712_v42  ;;  %v356_v42 = vrot.slane %v3067_v28, 2  ;;  %v2757_v28 = vld [vmem:[%s3808_s2 + $0xe0] sm:$0xff] }
  0xa9   :  { %v3336_v45 = vadd.f32 %v857_v20, %v809_v41  ;;  %v2765_v20 = vld [vmem:[%s3809_s3 + $0x20] sm:$0xff]  ;;  %v355_v41 = vrot.slane %v3059_v25, 2  ;;  %1446 = vmatpush.bf16.msra.mxu0 %v2757_v28 }
  0xaa   :  { %1821 = vmatpush.bf16.msra.mxu1 %v2765_v20 }
  0xae   :  { %v810_v49 = vpop.f32.mrf.mxu2  ;;  %v715_v6 = vpop.f32.mrf.mxu0 }
  0xaf   :  { %v859_v1 = vpop.f32.mrf.mxu3  ;;  %v811_v2 = vadd.f32 %v810_v49, %v762_v44  ;;  %v764_v7 = vpop.f32.mrf.mxu1  ;;  %v357_v49 = vsel %vm348_vm3, %v355_v41, %v356_v42 }
  0xb0   :  { %v765_v9 = vadd.f32 %v764_v7, %v715_v6  ;;  %v2772_v6 = vld [vmem:[%s3809_s3 + $0x58] sm:$0xff] }
  0xb1   :  { %v3344_v10 = vadd.f32 %v859_v1, %v811_v2  ;;  %910 = vmatmul.bf16.gmra.mxu0 %v354_v8  ;;  %v2780_v7 = vld [vmem:[%s3809_s3 + $0x98] sm:$0xff]  ;;  %1871 = vmatpush.bf16.msra.mxu2 %v2772_v6 }
  0xb2   :  { %1309 = vmatmul.bf16.gmra.mxu1 %v3003_v56  ;;  %1920 = vmatpush.bf16.msra.mxu3 %v2780_v7 }
  0xb3   :  { %1358 = vmatmul.bf16.gmra.mxu2 %v3054_v24 }
  0xb4   :  { %1407 = vmatmul.bf16.gmra.mxu3 %v3062_v26 }
  0xb6   :  { %v813_v30 = vpop.f32.mrf.mxu2  ;;  %v717_v33 = vpop.f32.mrf.mxu0 }
  0xb7   :  { %v862_v31 = vpop.f32.mrf.mxu3  ;;  %v814_v32 = vadd.f32 %v813_v30, %v765_v9  ;;  %v766_v23 = vpop.f32.mrf.mxu1 }
  0xb8   :  { %v767_v39 = vadd.f32 %v766_v23, %v717_v33  ;;  %v358_v33 = vrot.slane %v3100_v51, 2  ;;  %v359_v23 = vrot.slane %v3108_v54, 2  ;;  %v2756_v54 = vld [vmem:[%s3808_s2 + $0xd8] sm:$0xff] }
  0xb9   :  { %v3358_v40 = vadd.f32 %v862_v31, %v814_v32  ;;  %v2764_v32 = vld [vmem:[%s3809_s3 + $0x18] sm:$0xff]  ;;  %1447 = vmatpush.bf16.msra.mxu0 %v2756_v54 }
  0xba   :  { %1822 = vmatpush.bf16.msra.mxu1 %v2764_v32 }
  0xbe   :  { %v815_v43 = vpop.f32.mrf.mxu2  ;;  %v720_v47 = vpop.f32.mrf.mxu0 }
  0xbf   :  { %v864_v44 = vpop.f32.mrf.mxu3  ;;  %v816_v46 = vadd.f32 %v815_v43, %v767_v39  ;;  %v769_v48 = vpop.f32.mrf.mxu1 }
  0xc0   :  { %v770_v1 = vadd.f32 %v769_v48, %v720_v47  ;;  %v2771_v48 = vld [vmem:[%s3809_s3 + $0x50] sm:$0xff] }
  0xc1   :  { %v3366_v2 = vadd.f32 %v864_v44, %v816_v46  ;;  %915 = vmatmul.bf16.gmra.mxu0 %v357_v49  ;;  %v360_v44 = vsel %vm348_vm3, %v358_v33, %v359_v23  ;;  %v2779_v49 = vld [vmem:[%s3809_s3 + $0x90] sm:$0xff]  ;;  %1872 = vmatpush.bf16.msra.mxu2 %v2771_v48 }
  0xc2   :  { %1314 = vmatmul.bf16.gmra.mxu1 %v3059_v25  ;;  %1921 = vmatpush.bf16.msra.mxu3 %v2779_v49 }
  0xc3   :  { %1363 = vmatmul.bf16.gmra.mxu2 %v3095_v50 }
  0xc4   :  { %1412 = vmatmul.bf16.gmra.mxu3 %v3103_v52 }
  0xc6   :  { %v818_v8 = vpop.f32.mrf.mxu2  ;;  %v722_v11 = vpop.f32.mrf.mxu0 }
  0xc7   :  { %v867_v9 = vpop.f32.mrf.mxu3  ;;  %v819_v60 = vadd.f32 %v818_v8, %v770_v1  ;;  %v771_v29 = vpop.f32.mrf.mxu1 }
  0xc8   :  { %v772_v30 = vadd.f32 %v771_v29, %v722_v11  ;;  %v2763_v11 = vld [vmem:[%s3809_s3 + $0x10] sm:$0xff]  ;;  %v361_v29 = vrot.slane %v3141_v18, 2 }
  0xc9   :  { %v3380_v31 = vadd.f32 %v867_v9, %v819_v60  ;;  %1823 = vmatpush.bf16.msra.mxu1 %v2763_v11  ;;  %v365_v11 = vrot.slane %v3190_v0, 2  ;;  %v2754_v0 = vld [vmem:[%s3808_s2 + $0xc8] sm:$0xff] }
  0xce   :  { %v820_v39 = vpop.f32.mrf.mxu2  ;;  %v725_v42 = vpop.f32.mrf.mxu0 }
  0xcf   :  { %v869_v20 = vpop.f32.mrf.mxu3  ;;  %v821_v41 = vadd.f32 %v820_v39, %v772_v30  ;;  %v774_v43 = vpop.f32.mrf.mxu1  ;;  %v362_v30 = vrot.slane %v3149_v22, 2  ;;  %v2755_v22 = vld [vmem:[%s3808_s2 + $0xd0] sm:$0xff] }
  0xd0   :  { %v775_v46 = vadd.f32 %v774_v43, %v725_v42  ;;  %1448 = vmatpush.bf16.msra.mxu0 %v2755_v22  ;;  %v2777_v22 = vld [vmem:[%s3809_s3 + $0x80] sm:$0xff] }
  0xd1   :  { %v3388_v47 = vadd.f32 %v869_v20, %v821_v41  ;;  %920 = vmatmul.bf16.gmra.mxu0 %v360_v44  ;;  %v363_v41 = vsel %vm348_vm3, %v361_v29, %v362_v30  ;;  %v2770_v44 = vld [vmem:[%s3809_s3 + $0x48] sm:$0xff] }
  0xd2   :  { %1319 = vmatmul.bf16.gmra.mxu1 %v3100_v51  ;;  %1873 = vmatpush.bf16.msra.mxu2 %v2770_v44 }
  0xd3   :  { %1368 = vmatmul.bf16.gmra.mxu2 %v3136_v17 }
  0xd4   :  { %1417 = vmatmul.bf16.gmra.mxu3 %v3144_v19  ;;  %1449 = vmatpush.bf16.msra.mxu0 %v2754_v0 }
  0xd6   :  { %v823_v1 = vpop.f32.mrf.mxu2  ;;  %v727_v7 = vpop.f32.mrf.mxu0 }
  0xd7   :  { %v872_v28 = vpop.f32.mrf.mxu3  ;;  %v824_v6 = vadd.f32 %v823_v1, %v775_v46  ;;  %v776_v8 = vpop.f32.mrf.mxu1  ;;  %v2778_v46 = vld [vmem:[%s3809_s3 + $0x88] sm:$0xff] }
  0xd8   :  { %v777_v9 = vadd.f32 %v776_v8, %v727_v7  ;;  %1922 = vmatpush.bf16.msra.mxu3 %v2778_v46  ;;  %v2762_v8 = vld [vmem:[%s3809_s3 + $0x8] sm:$0xff] }
  0xd9   :  { %v3402_v60 = vadd.f32 %v872_v28, %v824_v6  ;;  %1824 = vmatpush.bf16.msra.mxu1 %v2762_v8  ;;  %v367_v8 = vrot.slane %v3223_v35, 2 }
  0xdc   :  { %1923 = vmatpush.bf16.msra.mxu3 %v2777_v22 }
  0xde   :  { %v825_v32 = vpop.f32.mrf.mxu2  ;;  %v730_v39 = vpop.f32.mrf.mxu0 }
  0xdf   :  { %v874_v33 = vpop.f32.mrf.mxu3  ;;  %v826_v23 = vadd.f32 %v825_v32, %v777_v9  ;;  %v779_v20 = vpop.f32.mrf.mxu1  ;;  %v364_v9 = vrot.slane %v3182_v61, 2 }
  0xe0   :  { %v780_v42 = vadd.f32 %v779_v20, %v730_v39 }
  0xe1   :  { %v3410_v43 = vadd.f32 %v874_v33, %v826_v23  ;;  %925 = vmatmul.bf16.gmra.mxu0 %v363_v41  ;;  %v366_v39 = vsel %vm348_vm3, %v364_v9, %v365_v11  ;;  %v368_v9 = vrot.slane %v3231_v38, 2 }
  0xe2   :  { %1324 = vmatmul.bf16.gmra.mxu1 %v3141_v18 }
  0xe3   :  { %1373 = vmatmul.bf16.gmra.mxu2 %v3177_v59 }
  0xe4   :  { %1422 = vmatmul.bf16.gmra.mxu3 %v3185_v62 }
  0xe6   :  { %v828_v54 = vpop.f32.mrf.mxu2  ;;  %v732_v1 = vpop.f32.mrf.mxu0 }
  0xe7   :  { %v877_v48 = vpop.f32.mrf.mxu3  ;;  %v829_v49 = vadd.f32 %v828_v54, %v780_v42  ;;  %v781_v28 = vpop.f32.mrf.mxu1  ;;  %v2769_v42 = vld [vmem:[%s3809_s3 + $0x40] sm:$0xff] }
  0xe8   :  { %v782_v6 = vadd.f32 %v781_v28, %v732_v1  ;;  %1874 = vmatpush.bf16.msra.mxu2 %v2769_v42 }
  0xe9   :  { %v3424_v7 = vadd.f32 %v877_v48, %v829_v49 }
  0xee   :  { %v830_v29 = vpop.f32.mrf.mxu2  ;;  %v735_v33 = vpop.f32.mrf.mxu0 }
  0xef   :  { %v879_v30 = vpop.f32.mrf.mxu3  ;;  %v831_v32 = vadd.f32 %v830_v29, %v782_v6  ;;  %v784_v23 = vpop.f32.mrf.mxu1  ;;  %v2761_v6 = vld [vmem:[%s3809_s3] sm:$0xff]  ;;  %s2255_s3 = sshll.u32 %s3815_s9, 4  ;;  %s2256_s3 = int_to_ptr.hbm [resolvable:$true] %s2255_s3 }
  0xf0   :  { %v785_v20 = vadd.f32 %v784_v23, %v735_v33  ;;  %1825 = vmatpush.bf16.msra.mxu1 %v2761_v6 }
  0xf1   :  { %v3432_v41 = vadd.f32 %v879_v30, %v831_v32  ;;  %930 = vmatmul.bf16.gmra.mxu0 %v366_v39  ;;  %v2753_v30 = vld [vmem:[%s3808_s2 + $0xc0] sm:$0xff]  ;;  %v369_v39 = vsel %vm348_vm3, %v367_v8, %v368_v9 }
  0xf2   :  { %1329 = vmatmul.bf16.gmra.mxu1 %v3182_v61  ;;  %1450 = vmatpush.bf16.msra.mxu0 %v2753_v30 }
  0xf3   :  { %1378 = vmatmul.bf16.gmra.mxu2 %v3218_v34 }
  0xf4   :  { %1427 = vmatmul.bf16.gmra.mxu3 %v3226_v36 }
  0xf6   :  { %v833_v44 = vpop.f32.mrf.mxu2  ;;  %v737_v48 = vpop.f32.mrf.mxu0 }
  0xf7   :  { %v882_v46 = vpop.f32.mrf.mxu3  ;;  %v834_v54 = vadd.f32 %v833_v44, %v785_v20  ;;  %v786_v49 = vpop.f32.mrf.mxu1 }
  0xf8   :  { %v787_v1 = vadd.f32 %v786_v49, %v737_v48  ;;  %v370_v49 = vrot.slane %v3267_v13, 2 }
  0xf9   :  { %v3446_v28 = vadd.f32 %v882_v46, %v834_v54 }
  0xfe   :  { %v835_v11 = vpop.f32.mrf.mxu2  ;;  %v740_v33 = vpop.f32.mrf.mxu0 }
  0xff   :  { %v884_v29 = vpop.f32.mrf.mxu3  ;;  %v836_v32 = vadd.f32 %v835_v11, %v787_v1  ;;  %v789_v23 = vpop.f32.mrf.mxu1  ;;  %v371_v1 = vrot.slane %v3275_v16, 2 }
 0x100   :  { %v790_v20 = vadd.f32 %v789_v23, %v740_v33 }
 0x101   :  { %v3457_v0 = vadd.f32 %v884_v29, %v836_v32  ;;  %935 = vmatmul.bf16.gmra.mxu0 %v369_v39  ;;  %v372_v30 = vsel %vm348_vm3, %v370_v49, %v371_v1 }
 0x102   :  { %1334 = vmatmul.bf16.gmra.mxu1 %v3223_v35 }
 0x103   :  { %1383 = vmatmul.bf16.gmra.mxu2 %v3262_v12 }
 0x104   :  { %1432 = vmatmul.bf16.gmra.mxu3 %v3270_v14 }
 0x106   :  { %v838_v38 = vpop.f32.mrf.mxu2  ;;  %v742_v44 = vpop.f32.mrf.mxu0 }
 0x107   :  { %v887_v42 = vpop.f32.mrf.mxu3  ;;  %v839_v22 = vadd.f32 %v838_v38, %v790_v20  ;;  %v791_v46 = vpop.f32.mrf.mxu1 }
 0x108   :  { %v792_v54 = vadd.f32 %v791_v46, %v742_v44 }
 0x109   :  { %v3462_v48 = vadd.f32 %v887_v42, %v839_v22 }
 0x10e   :  { %v840_v6 = vpop.f32.mrf.mxu2  ;;  %v745_v11 = vpop.f32.mrf.mxu0 }
 0x10f   :  { %v889_v8 = vpop.f32.mrf.mxu3  ;;  %v841_v9 = vadd.f32 %v840_v6, %v792_v54  ;;  %v794_v29 = vpop.f32.mrf.mxu1 }
 0x110   :  { %v795_v32 = vadd.f32 %v794_v29, %v745_v11 }
 0x111   :  { %v3467_v33 = vadd.f32 %v889_v8, %v841_v9  ;;  %940 = vmatmul.bf16.gmra.mxu0 %v372_v30  ;;  %v2794_v9 = vld [vmem:[%s3806_s0] sm:$0xff] }
 0x112   :  { %1339 = vmatmul.bf16.gmra.mxu1 %v3267_v13 }
 0x113   :  { %1388 = vmatmul.bf16.gmra.mxu2 %v3297_v3 }
 0x114   :  { %1437 = vmatmul.bf16.gmra.mxu3 %v3300_v4 }
 0x116   :  { %v843_v23 = vpop.f32.mrf.mxu2  ;;  %v747_v20 = vpop.f32.mrf.mxu0 }
 0x117   :  { %v892_v39 = vpop.f32.mrf.mxu3  ;;  %v844_v16 = vadd.f32 %v843_v23, %v795_v32  ;;  %v796_v38 = vpop.f32.mrf.mxu1 }
 0x118   :  { %v797_v42 = vadd.f32 %v796_v38, %v747_v20 }
 0x119   :  { %v3472_v22 = vadd.f32 %v892_v39, %v844_v16 }
 0x11e   :  { %v845_v44 = vpop.f32.mrf.mxu2  ;;  %v906_v49 = vpop.f32.mrf.mxu0 }
 0x11f   :  { %v894_v46 = vpop.f32.mrf.mxu3  ;;  %v846_v54 = vadd.f32 %v845_v44, %v797_v42  ;;  %v1305_v1 = vpop.f32.mrf.mxu1  ;;  %v907_v6 = vadd.f32 %v906_v49, %v3336_v45 }
 0x121   :  { %v3475_v8 = vadd.f32 %v894_v46, %v846_v54  ;;  %1451 = vmatmul.bf16.vlgmr.msra.gmra.mxu0 %v3009_v58  ;;  %v947_v58 = vsel %vm946_vm4, %v907_v6, -inf }
 0x122   :  { %1826 = vmatmul.bf16.vlgmr.msra.gmra.mxu1 %v2794_v9 }
 0x123   :  { %1875 = vmatmul.bf16.vlgmr.msra.gmra.mxu2 %v2998_v55 }
 0x124   :  { %1924 = vmatmul.bf16.vlgmr.msra.gmra.mxu3 %v3006_v57 }
 0x126   :  { %v1354_v11 = vpop.f32.mrf.mxu2  ;;  %v908_v32 = vpop.f32.mrf.mxu0 }
 0x127   :  { %v1403_v29 = vpop.f32.mrf.mxu3  ;;  %v1355_v30 = vadd.f32 %v1354_v11, %v1305_v1  ;;  %v1307_v45 = vpop.f32.mrf.mxu1  ;;  %v909_v23 = vadd.f32 %v908_v32, %v3344_v10 }
 0x129   :  { %v3484_v39 = vadd.f32 %v1403_v29, %v1355_v30  ;;  %v949_v16 = vsel %vm948_vm5, %v909_v23, -inf }
 0x12a   :  { %v950_v20 = vmax.f32 %v947_v58, %v949_v16 }
 0x12c   :  { %v951_v54 = vrot.slane %v950_v20, 4 }
 0x12e   :  { %v1356_v38 = vpop.f32.mrf.mxu2  ;;  %v911_v57 = vpop.f32.mrf.mxu0  ;;  %v952_v10 = vmax.f32 %v950_v20, %v951_v54 }
 0x12f   :  { %v1405_v55 = vpop.f32.mrf.mxu3  ;;  %v1357_v42 = vadd.f32 %v1356_v38, %v1307_v45  ;;  %v1310_v44 = vpop.f32.mrf.mxu1  ;;  %v912_v46 = vadd.f32 %v911_v57, %v3358_v40 }
 0x130   :  { %v953_v40 = vrot.slane %v952_v10, 2 }
 0x131   :  { %v3489_v49 = vadd.f32 %v1405_v55, %v1357_v42  ;;  %1456 = vmatmul.bf16.gmra.mxu0 %v3065_v27  ;;  %v957_v45 = vsel %vm946_vm4, %v912_v46, -inf }
 0x132   :  { %1831 = vmatmul.bf16.gmra.mxu1 %v3003_v56  ;;  %v954_v23 = vmax.f32 %v952_v10, %v953_v40  ;;  %v3510_v10 = vld [vmem:[%s3810_s4] ss:$0 sm:$0xff]  ;;  %s2821_s4 = smov 112  }
 0x133   :  { %1880 = vmatmul.bf16.gmra.mxu2 %v3054_v24 }
 0x134   :  { %1929 = vmatmul.bf16.gmra.mxu3 %v3062_v26  ;;  %v955_v57 = vrot.slane %v954_v23, 1 }
 0x136   :  { %v1359_v1 = vpop.f32.mrf.mxu2  ;;  %v913_v11 = vpop.f32.mrf.mxu0  ;;  %v956_v54 = vmax.f32 %v954_v23, %v955_v57 }
 0x137   :  { %v1408_v6 = vpop.f32.mrf.mxu3  ;;  %v1360_v9 = vadd.f32 %v1359_v1, %v1310_v44  ;;  %v1312_v29 = vpop.f32.mrf.mxu1  ;;  %v914_v30 = vadd.f32 %v913_v11, %v3366_v2 }
 0x139   :  { %v3496_v32 = vadd.f32 %v1408_v6, %v1360_v9  ;;  %v958_v27 = vsel %vm948_vm5, %v914_v30, -inf  ;;  %v1024_v30 = vadd.f32 %v3510_v10, %v956_v54 }
 0x13a   :  { %v959_v56 = vmax.f32 %v957_v45, %v958_v27 }
 0x13b   :  { %v1032_v23 = vmax.f32 %v1024_v30, 0.0 }
 0x13c   :  { %v960_v24 = vrot.slane %v959_v56, 4 }
 0x13e   :  { %v1361_v58 = vpop.f32.mrf.mxu2  ;;  %v961_v16 = vmax.f32 %v959_v56, %v960_v24  ;;  %v916_v38 = vpop.f32.mrf.mxu0 }
 0x13f   :  { %v1410_v26 = vpop.f32.mrf.mxu3  ;;  %v1362_v20 = vadd.f32 %v1361_v58, %v1312_v29  ;;  %v1315_v55 = vpop.f32.mrf.mxu1  ;;  %v917_v42 = vadd.f32 %v916_v38, %v3380_v31 }
 0x140   :  { %v962_v2 = vrot.slane %v961_v16, 2 }
 0x141   :  { %v3501_v44 = vadd.f32 %v1410_v26, %v1362_v20  ;;  %1461 = vmatmul.bf16.gmra.mxu0 %v3106_v53  ;;  %v966_v40 = vsel %vm946_vm4, %v917_v42, -inf }
 0x142   :  { %1836 = vmatmul.bf16.gmra.mxu1 %v3059_v25  ;;  %v963_v46 = vmax.f32 %v961_v16, %v962_v2 }
 0x143   :  { %1885 = vmatmul.bf16.gmra.mxu2 %v3095_v50 }
 0x144   :  { %1934 = vmatmul.bf16.gmra.mxu3 %v3103_v52  ;;  %v964_v31 = vrot.slane %v963_v46, 1 }
 0x146   :  { %v1364_v1 = vpop.f32.mrf.mxu2  ;;  %v965_v9 = vmax.f32 %v963_v46, %v964_v31  ;;  %v918_v29 = vpop.f32.mrf.mxu0 }
 0x147   :  { %v1413_v6 = vpop.f32.mrf.mxu3  ;;  %v1365_v11 = vadd.f32 %v1364_v1, %v1315_v55  ;;  %v1317_v53 = vpop.f32.mrf.mxu1  ;;  %v919_v25 = vadd.f32 %v918_v29, %v3388_v47 }
 0x148   :  { %v1025_v50 = vadd.f32 %v3510_v10, %v965_v9 }
 0x149   :  { %v3515_v52 = vadd.f32 %v1413_v6, %v1365_v11  ;;  %v967_v45 = vsel %vm948_vm5, %v919_v25, -inf }
 0x14a   :  { %v1033_v27 = vmax.f32 %v1025_v50, 0.0  ;;  %v968_v56 = vmax.f32 %v966_v40, %v967_v45 }
 0x14c   :  { %v2139_v24 = vrot.slane %v1033_v27, 7  ;;  %v969_v58 = vrot.slane %v968_v56, 4 }
 0x14e   :  { %v1366_v26 = vpop.f32.mrf.mxu2  ;;  %v970_v20 = vmax.f32 %v968_v56, %v969_v58  ;;  %v921_v38 = vpop.f32.mrf.mxu0  ;;  %v2141_v57 = vsel %vm2140_vm6, %v2139_v24, %v1032_v23 }
 0x14f   :  { %v1415_v16 = vpop.f32.mrf.mxu3  ;;  %v1367_v47 = vadd.f32 %v1366_v26, %v1317_v53  ;;  %v1320_v55 = vpop.f32.mrf.mxu1  ;;  %v922_v2 = vadd.f32 %v921_v38, %v3402_v60 }
 0x150   :  { %v971_v46 = vrot.slane %v970_v20, 2 }
 0x151   :  { %v3521_v42 = vadd.f32 %v1415_v16, %v1367_v47  ;;  %1466 = vmatmul.bf16.gmra.mxu0 %v3147_v21 }
 0x152   :  { %1841 = vmatmul.bf16.gmra.mxu1 %v3100_v51  ;;  %v972_v54 = vmax.f32 %v970_v20, %v971_v46  ;;  %v975_v51 = vsel %vm946_vm4, %v922_v2, -inf }
 0x153   :  { %1890 = vmatmul.bf16.gmra.mxu2 %v3136_v17 }
 0x154   :  { %1939 = vmatmul.bf16.gmra.mxu3 %v3144_v19  ;;  %v973_v31 = vrot.slane %v972_v54, 1 }
 0x156   :  { %v1369_v1 = vpop.f32.mrf.mxu2  ;;  %v974_v9 = vmax.f32 %v972_v54, %v973_v31  ;;  %v923_v29 = vpop.f32.mrf.mxu0 }
 0x157   :  { %v1418_v6 = vpop.f32.mrf.mxu3  ;;  %v1370_v11 = vadd.f32 %v1369_v1, %v1320_v55  ;;  %v1322_v53 = vpop.f32.mrf.mxu1  ;;  %v924_v60 = vadd.f32 %v923_v29, %v3410_v43 }
 0x158   :  { %v1026_v25 = vadd.f32 %v3510_v10, %v974_v9 }
 0x159   :  { %v3529_v30 = vadd.f32 %v1418_v6, %v1370_v11  ;;  %v976_v21 = vsel %vm948_vm5, %v924_v60, -inf }
 0x15a   :  { %v1034_v17 = vmax.f32 %v1026_v25, 0.0  ;;  %v977_v50 = vmax.f32 %v975_v51, %v976_v21 }
 0x15c   :  { %v2142_v19 = vrot.slane %v1034_v17, 6  ;;  %v978_v40 = vrot.slane %v977_v50, 4 }
 0x15e   :  { %v1371_v45 = vpop.f32.mrf.mxu2  ;;  %v979_v56 = vmax.f32 %v977_v50, %v978_v40  ;;  %v926_v24 = vpop.f32.mrf.mxu0  ;;  %v2144_v43 = vsel %vm2143_vm7, %v2142_v19, %v2141_v57 }
 0x15f   :  { %v1420_v27 = vpop.f32.mrf.mxu3  ;;  %v1372_v23 = vadd.f32 %v1371_v45, %v1322_v53  ;;  %v1325_v58 = vpop.f32.mrf.mxu1  ;;  %v927_v38 = vadd.f32 %v926_v24, %v3424_v7 }
 0x160   :  { %v980_v26 = vrot.slane %v979_v56, 2 }
 0x161   :  { %v3534_v16 = vadd.f32 %v1420_v27, %v1372_v23  ;;  %1471 = vmatmul.bf16.gmra.mxu0 %v3188_v63 }
 0x162   :  { %1846 = vmatmul.bf16.gmra.mxu1 %v3141_v18  ;;  %v981_v20 = vmax.f32 %v979_v56, %v980_v26  ;;  %v984_v18 = vsel %vm946_vm4, %v927_v38, -inf }
 0x163   :  { %1895 = vmatmul.bf16.gmra.mxu2 %v3177_v59 }
 0x164   :  { %1944 = vmatmul.bf16.gmra.mxu3 %v3185_v62  ;;  %v982_v47 = vrot.slane %v981_v20, 1 }
 0x166   :  { %v1374_v55 = vpop.f32.mrf.mxu2  ;;  %v983_v46 = vmax.f32 %v981_v20, %v982_v47  ;;  %v928_v57 = vpop.f32.mrf.mxu0 }
 0x167   :  { %v1423_v2 = vpop.f32.mrf.mxu3  ;;  %v1375_v54 = vadd.f32 %v1374_v55, %v1325_v58  ;;  %v1327_v31 = vpop.f32.mrf.mxu1  ;;  %v929_v1 = vadd.f32 %v928_v57, %v3432_v41 }
 0x168   :  { %v1027_v63 = vadd.f32 %v3510_v10, %v983_v46 }
 0x169   :  { %v3543_v6 = vadd.f32 %v1423_v2, %v1375_v54  ;;  %v985_v59 = vsel %vm948_vm5, %v929_v1, -inf }
 0x16a   :  { %v1035_v62 = vmax.f32 %v1027_v63, 0.0  ;;  %v986_v9 = vmax.f32 %v984_v18, %v985_v59 }
 0x16c   :  { %v2145_v7 = vrot.slane %v1035_v62, 5  ;;  %v987_v11 = vrot.slane %v986_v9, 4 }
 0x16e   :  { %v1376_v29 = vpop.f32.mrf.mxu2  ;;  %v988_v60 = vmax.f32 %v986_v9, %v987_v11  ;;  %v931_v51 = vpop.f32.mrf.mxu0  ;;  %v2147_v41 = vsel %vm2146_vm8, %v2145_v7, %v2144_v43 }
 0x16f   :  { %v1425_v53 = vpop.f32.mrf.mxu3  ;;  %v1377_v25 = vadd.f32 %v1376_v29, %v1327_v31  ;;  %v1330_v21 = vpop.f32.mrf.mxu1  ;;  %v932_v17 = vadd.f32 %v931_v51, %v3446_v28 }
 0x170   :  { %v989_v50 = vrot.slane %v988_v60, 2 }
 0x171   :  { %v3549_v19 = vadd.f32 %v1425_v53, %v1377_v25  ;;  %1476 = vmatmul.bf16.gmra.mxu0 %v3229_v37 }
 0x172   :  { %1851 = vmatmul.bf16.gmra.mxu1 %v3182_v61  ;;  %v990_v40 = vmax.f32 %v988_v60, %v989_v50  ;;  %v993_v61 = vsel %vm946_vm4, %v932_v17, -inf }
 0x173   :  { %1900 = vmatmul.bf16.gmra.mxu2 %v3218_v34 }
 0x174   :  { %1949 = vmatmul.bf16.gmra.mxu3 %v3226_v36  ;;  %v991_v45 = vrot.slane %v990_v40, 1 }
 0x176   :  { %v1379_v27 = vpop.f32.mrf.mxu2  ;;  %v992_v23 = vmax.f32 %v990_v40, %v991_v45  ;;  %v933_v58 = vpop.f32.mrf.mxu0 }
 0x177   :  { %v1428_v56 = vpop.f32.mrf.mxu3  ;;  %v1380_v24 = vadd.f32 %v1379_v27, %v1330_v21  ;;  %v1332_v43 = vpop.f32.mrf.mxu1  ;;  %v934_v28 = vadd.f32 %v933_v58, %v3457_v0 }
 0x178   :  { %v1028_v26 = vadd.f32 %v3510_v10, %v992_v23 }
 0x179   :  { %v3557_v20 = vadd.f32 %v1428_v56, %v1380_v24  ;;  %v994_v37 = vsel %vm948_vm5, %v934_v28, -inf }
 0x17a   :  { %v1036_v34 = vmax.f32 %v1028_v26, 0.0  ;;  %v995_v47 = vmax.f32 %v993_v61, %v994_v37 }
 0x17c   :  { %v2148_v36 = vrot.slane %v1036_v34, 4  ;;  %v996_v38 = vrot.slane %v995_v47, 4 }
 0x17e   :  { %v1381_v55 = vpop.f32.mrf.mxu2  ;;  %v997_v46 = vmax.f32 %v995_v47, %v996_v38  ;;  %v936_v57 = vpop.f32.mrf.mxu0  ;;  %v2150_v0 = vsel %vm2149_vm9, %v2148_v36, %v2147_v41 }
 0x17f   :  { %v1430_v2 = vpop.f32.mrf.mxu3  ;;  %v1382_v54 = vadd.f32 %v1381_v55, %v1332_v43  ;;  %v1335_v31 = vpop.f32.mrf.mxu1  ;;  %v937_v1 = vadd.f32 %v936_v57, %v3462_v48 }
 0x180   :  { %v998_v63 = vrot.slane %v997_v46, 2 }
 0x181   :  { %v3563_v18 = vadd.f32 %v1430_v2, %v1382_v54  ;;  %1481 = vmatmul.bf16.gmra.mxu0 %v3273_v15 }
 0x182   :  { %1856 = vmatmul.bf16.gmra.mxu1 %v3223_v35  ;;  %v999_v59 = vmax.f32 %v997_v46, %v998_v63  ;;  %v1002_v35 = vsel %vm946_vm4, %v937_v1, -inf }
 0x183   :  { %1905 = vmatmul.bf16.gmra.mxu2 %v3262_v12 }
 0x184   :  { %1954 = vmatmul.bf16.gmra.mxu3 %v3270_v14  ;;  %v1000_v62 = vrot.slane %v999_v59, 1 }
 0x186   :  { %v1384_v9 = vpop.f32.mrf.mxu2  ;;  %v1001_v11 = vmax.f32 %v999_v59, %v1000_v62  ;;  %v938_v53 = vpop.f32.mrf.mxu0 }
 0x187   :  { %v1433_v7 = vpop.f32.mrf.mxu3  ;;  %v1385_v29 = vadd.f32 %v1384_v9, %v1335_v31  ;;  %v1337_v60 = vpop.f32.mrf.mxu1  ;;  %v939_v48 = vadd.f32 %v938_v53, %v3467_v33 }
 0x188   :  { %v1029_v25 = vadd.f32 %v3510_v10, %v1001_v11 }
 0x189   :  { %v3571_v51 = vadd.f32 %v1433_v7, %v1385_v29  ;;  %v1003_v15 = vsel %vm948_vm5, %v939_v48, -inf }
 0x18a   :  { %v1037_v12 = vmax.f32 %v1029_v25, 0.0  ;;  %v1004_v21 = vmax.f32 %v1002_v35, %v1003_v15 }
 0x18c   :  { %v2151_v14 = vrot.slane %v1037_v12, 3  ;;  %v1005_v41 = vrot.slane %v1004_v21, 4 }
 0x18e   :  { %v1386_v17 = vpop.f32.mrf.mxu2  ;;  %v1006_v40 = vmax.f32 %v1004_v21, %v1005_v41  ;;  %v941_v27 = vpop.f32.mrf.mxu0  ;;  %v2153_v33 = vsel %vm2152_vm10, %v2151_v14, %v2150_v0 }
 0x18f   :  { %v1435_v50 = vpop.f32.mrf.mxu3  ;;  %v1387_v45 = vadd.f32 %v1386_v17, %v1337_v60  ;;  %v1340_v56 = vpop.f32.mrf.mxu1  ;;  %v942_v23 = vadd.f32 %v941_v27, %v3472_v22 }
 0x190   :  { %v1007_v24 = vrot.slane %v1006_v40, 2 }
 0x191   :  { %v3577_v58 = vadd.f32 %v1435_v50, %v1387_v45  ;;  %1486 = vmatmul.bf16.gmra.mxu0 %v3303_v5 }
 0x192   :  { %1861 = vmatmul.bf16.gmra.mxu1 %v3267_v13  ;;  %v1008_v43 = vmax.f32 %v1006_v40, %v1007_v24  ;;  %v1011_v13 = vsel %vm946_vm4, %v942_v23, -inf }
 0x193   :  { %1910 = vmatmul.bf16.gmra.mxu2 %v3297_v3 }
 0x194   :  { %1959 = vmatmul.bf16.gmra.mxu3 %v3300_v4  ;;  %v1009_v28 = vrot.slane %v1008_v43, 1 }
 0x196   :  { %v1389_v26 = vpop.f32.mrf.mxu2  ;;  %v1010_v37 = vmax.f32 %v1008_v43, %v1009_v28  ;;  %v943_v47 = vpop.f32.mrf.mxu0 }
 0x197   :  { %v1438_v61 = vpop.f32.mrf.mxu3  ;;  %v1390_v34 = vadd.f32 %v1389_v26, %v1340_v56  ;;  %v1342_v36 = vpop.f32.mrf.mxu1  ;;  %v944_v22 = vadd.f32 %v943_v47, %v3475_v8 }
 0x198   :  { %v1030_v38 = vadd.f32 %v3510_v10, %v1010_v37 }
 0x199   :  { %v3585_v55 = vadd.f32 %v1438_v61, %v1390_v34  ;;  %v1012_v5 = vsel %vm948_vm5, %v944_v22, -inf }
 0x19a   :  { %v1013_v3 = vmax.f32 %v1011_v13, %v1012_v5  ;;  %v1038_v2 = vmax.f32 %v1030_v38, 0.0 }
 0x19c   :  { %v1014_v4 = vrot.slane %v1013_v3, 4  ;;  %v2154_v46 = vrot.slane %v1038_v2, 2 }
 0x19e   :  { %v1391_v54 = vpop.f32.mrf.mxu2  ;;  %v1015_v31 = vmax.f32 %v1013_v3, %v1014_v4  ;;  %v1452_v1 = vpop.f32.mrf.mxu0  ;;  %v2156_v8 = vsel %vm2155_vm11, %v2154_v46, %v2153_v33 }
 0x19f   :  { %v1440_v57 = vpop.f32.mrf.mxu3  ;;  %v1392_v0 = vadd.f32 %v1391_v54, %v1342_v36  ;;  %v1827_v63 = vpop.f32.mrf.mxu1  ;;  %v1453_v11 = vadd.f32 %v1452_v1, %v3484_v39 }
 0x1a0   :  { %v1016_v59 = vrot.slane %v1015_v31, 2 }
 0x1a1   :  { %v3590_v62 = vadd.f32 %v1440_v57, %v1392_v0  ;;  %v1493_v12 = vsel %vm1492_vm12, %v1453_v11, -inf }
 0x1a2   :  { %v1017_v9 = vmax.f32 %v1015_v31, %v1016_v59 }
 0x1a4   :  { %v1018_v7 = vrot.slane %v1017_v9, 1 }
 0x1a6   :  { %v1876_v29 = vpop.f32.mrf.mxu2  ;;  %v1019_v60 = vmax.f32 %v1017_v9, %v1018_v7  ;;  %v1454_v48 = vpop.f32.mrf.mxu0 }
 0x1a7   :  { %v1925_v53 = vpop.f32.mrf.mxu3  ;;  %v1829_v25 = vpop.f32.mrf.mxu1  ;;  %v1455_v35 = vadd.f32 %v1454_v48, %v3489_v49  ;;  %v1877_v14 = vadd.f32 %v1876_v29, %v1827_v63 }
 0x1a8   :  { %v1031_v15 = vadd.f32 %v3510_v10, %v1019_v60 }
 0x1a9   :  { %v1495_v21 = vsel %vm1494_vm13, %v1455_v35, -inf  ;;  %v1926_v27 = vadd.f32 %v1925_v53, %v1877_v14 }
 0x1aa   :  { %v1496_v41 = vmax.f32 %v1493_v12, %v1495_v21  ;;  %v1039_v17 = vmax.f32 %v1031_v15, 0.0 }
 0x1ab   :  { %v1966_v28 = vsel %vm1965_vm15, %v1926_v27, -inf }
 0x1ac   :  { %v1497_v39 = vrot.slane %v1496_v41, 4  ;;  %v2157_v50 = vrot.slane %v1039_v17, 1 }
 0x1ae   :  { %v1878_v40 = vpop.f32.mrf.mxu2  ;;  %v1457_v33 = vpop.f32.mrf.mxu0  ;;  %v1498_v24 = vmax.f32 %v1496_v41, %v1497_v39  ;;  %v3598_v49 = vsel %vm2158_vm14, %v2157_v50, %v2156_v8 }
 0x1af   :  { %v1927_v45 = vpop.f32.mrf.mxu3  ;;  %v1879_v56 = vadd.f32 %v1878_v40, %v1829_v25  ;;  %v1832_v23 = vpop.f32.mrf.mxu1  ;;  %v1458_v36 = vadd.f32 %v1457_v33, %v3496_v32 }
 0x1b0   :  { %v1499_v43 = vrot.slane %v1498_v24, 2 }
 0x1b1   :  { %v1928_v10 = vadd.f32 %v1927_v45, %v1879_v56  ;;  %v1503_v54 = vsel %vm1492_vm12, %v1458_v36, -inf }
 0x1b2   :  { %v1500_v61 = vmax.f32 %v1498_v24, %v1499_v43 }
 0x1b3   :  { %v1968_v26 = vsel %vm1967_vm0, %v1928_v10, -inf }
 0x1b4   :  { %v1969_v37 = vmax.f32 %v1966_v28, %v1968_v26  ;;  %v1501_v34 = vrot.slane %v1500_v61, 1 }
 0x1b6   :  { %v1970_v47 = vrot.slane %v1969_v37, 4  ;;  %v1881_v22 = vpop.f32.mrf.mxu2  ;;  %v1459_v13 = vpop.f32.mrf.mxu0  ;;  %v3603_v3 = vmax.f32 %v1500_v61, %v1501_v34 }
 0x1b7   :  { %v1930_v38 = vpop.f32.mrf.mxu3  ;;  %v1834_v5 = vpop.f32.mrf.mxu1  ;;  %v1460_v4 = vadd.f32 %v1459_v13, %v3501_v44  ;;  %v1882_v31 = vadd.f32 %v1881_v22, %v1832_v23 }
 0x1b8   :  { %v1971_v2 = vmax.f32 %v1969_v37, %v1970_v47  ;;  %1574 = vrot.lane.b32.xlu1 %v3603_v3, %s2821_s4 }
 0x1b9   :  { %v1504_v57 = vsel %vm1494_vm13, %v1460_v4, -inf  ;;  %v1931_v9 = vadd.f32 %v1930_v38, %v1882_v31 }
 0x1ba   :  { %v1972_v46 = vrot.slane %v1971_v2, 2  ;;  %v1505_v32 = vmax.f32 %v1503_v54, %v1504_v57 }
 0x1bb   :  { %v1976_v25 = vsel %vm1965_vm15, %v1931_v9, -inf }
 0x1bc   :  { %v1973_v0 = vmax.f32 %v1971_v2, %v1972_v46  ;;  %v1506_v1 = vrot.slane %v1505_v32, 4 }
 0x1be   :  { %v1883_v63 = vpop.f32.mrf.mxu2  ;;  %v1974_v59 = vrot.slane %v1973_v0, 1  ;;  %v1462_v11 = vpop.f32.mrf.mxu0  ;;  %v1507_v29 = vmax.f32 %v1505_v32, %v1506_v1 }
 0x1bf   :  { %v1932_v8 = vpop.f32.mrf.mxu3  ;;  %v1884_v7 = vadd.f32 %v1883_v63, %v1834_v5  ;;  %v1837_v44 = vpop.f32.mrf.mxu1  ;;  %v1463_v41 = vadd.f32 %v1462_v11, %v3515_v52 }
 0x1c0   :  { %v3610_v53 = vmax.f32 %v1973_v0, %v1974_v59  ;;  %v1508_v48 = vrot.slane %v1507_v29, 2 }
 0x1c1   :  { %v1933_v60 = vadd.f32 %v1932_v8, %v1884_v7  ;;  %v1512_v23 = vsel %vm1492_vm12, %v1463_v41, -inf }
 0x1c2   :  { %2079 = vrot.lane.b32.xlu1 %v3610_v53, %s2822_s21  ;;  %2047 = vrot.lane.b32.xlu2 %v3610_v53, %s2821_s4  ;;  %v1509_v15 = vmax.f32 %v1507_v29, %v1508_v48 }
 0x1c3   :  { %v1977_v35 = vsel %vm1967_vm0, %v1933_v60, -inf }
 0x1c4   :  { %v1978_v12 = vmax.f32 %v1976_v25, %v1977_v35  ;;  %v1510_v21 = vrot.slane %v1509_v15, 1 }
 0x1c6   :  { %v1979_v14 = vrot.slane %v1978_v12, 4  ;;  %v1886_v17 = vpop.f32.mrf.mxu2  ;;  %v1464_v50 = vpop.f32.mrf.mxu0  ;;  %v3619_v45 = vmax.f32 %v1509_v15, %v1510_v21 }
 0x1c7   :  { %v1935_v39 = vpop.f32.mrf.mxu3  ;;  %v1839_v40 = vpop.f32.mrf.mxu1  ;;  %v1465_v56 = vadd.f32 %v1464_v50, %v3521_v42  ;;  %v1887_v10 = vadd.f32 %v1886_v17, %v1837_v44 }
 0x1c8   :  { %v1980_v27 = vmax.f32 %v1978_v12, %v1979_v14  ;;  %1576 = vrot.lane.b32.xlu0 %v3619_v45, %s2821_s4 }
 0x1c9   :  { %v1513_v24 = vsel %vm1494_vm13, %v1465_v56, -inf  ;;  %v1936_v34 = vadd.f32 %v1935_v39, %v1887_v10 }
 0x1ca   :  { %v1981_v33 = vrot.slane %v1980_v27, 2  ;;  %v1514_v43 = vmax.f32 %v1512_v23, %v1513_v24 }
 0x1cb   :  { %v1985_v2 = vsel %vm1965_vm15, %v1936_v34, -inf }
 0x1cc   :  { %v1982_v52 = vmax.f32 %v1980_v27, %v1981_v33  ;;  %v1515_v28 = vrot.slane %v1514_v43, 4 }
 0x1ce   :  { %v1888_v26 = vpop.f32.mrf.mxu2  ;;  %v1983_v37 = vrot.slane %v1982_v52, 1  ;;  %v1516_v47 = vmax.f32 %v1514_v43, %v1515_v28  ;;  %v1467_v22 = vpop.f32.mrf.mxu0 }
 0x1cf   :  { %v1937_v61 = vpop.f32.mrf.mxu3  ;;  %v1889_v36 = vadd.f32 %v1888_v26, %v1839_v40  ;;  %v1842_v42 = vpop.f32.mrf.mxu1  ;;  %v1468_v32 = vadd.f32 %v1467_v22, %v3529_v30 }
 0x1d0   :  { %v3626_v38 = vmax.f32 %v1982_v52, %v1983_v37  ;;  %v1517_v13 = vrot.slane %v1516_v47, 2 }
 0x1d1   :  { %v1938_v5 = vadd.f32 %v1937_v61, %v1889_v36  ;;  %v1521_v44 = vsel %vm1492_vm12, %v1468_v32, -inf }
 0x1d2   :  { %2049 = vrot.lane.b32.xlu0 %v3626_v38, %s2821_s4  ;;  %v1518_v46 = vmax.f32 %v1516_v47, %v1517_v13 }
 0x1d3   :  { %v1986_v4 = vsel %vm1967_vm0, %v1938_v5, -inf }
 0x1d4   :  { %v1987_v54 = vmax.f32 %v1985_v2, %v1986_v4  ;;  %v1519_v57 = vrot.slane %v1518_v46, 1 }
 0x1d6   :  { %v1988_v31 = vrot.slane %v1987_v54, 4  ;;  %v1891_v0 = vpop.f32.mrf.mxu2  ;;  %v1469_v63 = vpop.f32.mrf.mxu0  ;;  %v3633_v59 = vmax.f32 %v1518_v46, %v1519_v57 }
 0x1d7   :  { %v1940_v1 = vpop.f32.mrf.mxu3  ;;  %v1844_v8 = vpop.f32.mrf.mxu1  ;;  %v1470_v7 = vadd.f32 %v1469_v63, %v3534_v16  ;;  %v1892_v30 = vadd.f32 %v1891_v0, %v1842_v42 }
 0x1d8   :  { %v1989_v9 = vmax.f32 %v1987_v54, %v1988_v31  ;;  %1578 = vrot.lane.b32.xlu1 %v3633_v59, %s2821_s4 }
 0x1d9   :  { %v1522_v29 = vsel %vm1494_vm13, %v1470_v7, -inf  ;;  %v1941_v21 = vadd.f32 %v1940_v1, %v1892_v30 }
 0x1da   :  { %v1990_v11 = vrot.slane %v1989_v9, 2  ;;  %2081 = vrot.lane.b32.xlu0 %v3626_v38, %s2822_s21  ;;  %v1523_v60 = vmax.f32 %v1521_v44, %v1522_v29 }
 0x1db   :  { %v1994_v27 = vsel %vm1965_vm15, %v1941_v21, -inf }
 0x1dc   :  { %v1991_v48 = vmax.f32 %v1989_v9, %v1990_v11  ;;  %v1524_v25 = vrot.slane %v1523_v60, 4 }
 0x1de   :  { %v1893_v35 = vpop.f32.mrf.mxu2  ;;  %v1992_v12 = vrot.slane %v1991_v48, 1  ;;  %v1525_v16 = vmax.f32 %v1523_v60, %v1524_v25  ;;  %v1472_v41 = vpop.f32.mrf.mxu0 }
 0x1df   :  { %v1942_v15 = vpop.f32.mrf.mxu3  ;;  %v1894_v14 = vadd.f32 %v1893_v35, %v1844_v8  ;;  %v1847_v17 = vpop.f32.mrf.mxu1  ;;  %v1473_v43 = vadd.f32 %v1472_v41, %v3543_v6 }
 0x1e0   :  { %v3642_v39 = vmax.f32 %v1991_v48, %v1992_v12  ;;  %v1526_v50 = vrot.slane %v1525_v16, 2 }
 0x1e1   :  { %v1943_v40 = vadd.f32 %v1942_v15, %v1894_v14  ;;  %v1530_v22 = vsel %vm1492_vm12, %v1473_v43, -inf }
 0x1e2   :  { %2051 = vrot.lane.b32.xlu1 %v3642_v39, %s2821_s4  ;;  %v1527_v33 = vmax.f32 %v1525_v16, %v1526_v50 }
 0x1e3   :  { %v1995_v56 = vsel %vm1967_vm0, %v1943_v40, -inf }
 0x1e4   :  { %v1996_v23 = vmax.f32 %v1994_v27, %v1995_v56  ;;  %v1528_v24 = vrot.slane %v1527_v33, 1 }
 0x1e6   :  { %v1997_v10 = vrot.slane %v1996_v23, 4  ;;  %v1896_v52 = vpop.f32.mrf.mxu2  ;;  %v1474_v26 = vpop.f32.mrf.mxu0  ;;  %v3649_v37 = vmax.f32 %v1527_v33, %v1528_v24 }
 0x1e7   :  { %v1945_v28 = vpop.f32.mrf.mxu3  ;;  %v1849_v61 = vpop.f32.mrf.mxu1  ;;  %v1475_v47 = vadd.f32 %v1474_v26, %v3549_v19  ;;  %v1897_v6 = vadd.f32 %v1896_v52, %v1847_v17 }
 0x1e8   :  { %v1998_v34 = vmax.f32 %v1996_v23, %v1997_v10  ;;  %1580 = vrot.lane.b32.xlu2 %v3649_v37, %s2821_s4 }
 0x1e9   :  { %v1531_v42 = vsel %vm1494_vm13, %v1475_v47, -inf  ;;  %v1946_v57 = vadd.f32 %v1945_v28, %v1897_v6 }
 0x1ea   :  { %v1999_v36 = vrot.slane %v1998_v34, 2  ;;  %2083 = vrot.lane.b32.xlu1 %v3642_v39, %s2822_s21  ;;  %v1532_v13 = vmax.f32 %v1530_v22, %v1531_v42 }
 0x1eb   :  { %v2003_v8 = vsel %vm1965_vm15, %v1946_v57, -inf }
 0x1ec   :  { %v2000_v5 = vmax.f32 %v1998_v34, %v1999_v36  ;;  %v1533_v2 = vrot.slane %v1532_v13, 4 }
 0x1ee   :  { %v1898_v4 = vpop.f32.mrf.mxu2  ;;  %v2001_v54 = vrot.slane %v2000_v5, 1  ;;  %v1477_v31 = vpop.f32.mrf.mxu0  ;;  %v1534_v0 = vmax.f32 %v1532_v13, %v1533_v2 }
 0x1ef   :  { %v1947_v46 = vpop.f32.mrf.mxu3  ;;  %v1899_v19 = vadd.f32 %v1898_v4, %v1849_v61  ;;  %v1852_v32 = vpop.f32.mrf.mxu1  ;;  %v1478_v29 = vadd.f32 %v1477_v31, %v3557_v20 }
 0x1f0   :  { %v3658_v1 = vmax.f32 %v2000_v5, %v2001_v54  ;;  %v1535_v7 = vrot.slane %v1534_v0, 2 }
 0x1f1   :  { %v1948_v63 = vadd.f32 %v1947_v46, %v1899_v19  ;;  %v1539_v16 = vsel %vm1492_vm12, %v1478_v29, -inf }
 0x1f2   :  { %2053 = vrot.lane.b32.xlu2 %v3658_v1, %s2821_s4  ;;  %v1536_v12 = vmax.f32 %v1534_v0, %v1535_v7 }
 0x1f3   :  { %v2004_v9 = vsel %vm1967_vm0, %v1948_v63, -inf }
 0x1f4   :  { %v2005_v11 = vmax.f32 %v2003_v8, %v2004_v9  ;;  %v1537_v50 = vrot.slane %v1536_v12, 1 }
 0x1f6   :  { %v2006_v44 = vrot.slane %v2005_v11, 4  ;;  %v1901_v30 = vpop.f32.mrf.mxu2  ;;  %v1479_v48 = vpop.f32.mrf.mxu0  ;;  %v3670_v52 = vmax.f32 %v1536_v12, %v1537_v50 }
 0x1f7   :  { %v1950_v60 = vpop.f32.mrf.mxu3  ;;  %v1854_v25 = vpop.f32.mrf.mxu1  ;;  %v1480_v15 = vadd.f32 %v1479_v48, %v3563_v18  ;;  %v1902_v41 = vadd.f32 %v1901_v30, %v1852_v32 }
 0x1f8   :  { %v2007_v35 = vmax.f32 %v2005_v11, %v2006_v44 }
 0x1f9   :  { %v1540_v14 = vsel %vm1494_vm13, %v1480_v15, -inf  ;;  %v1951_v23 = vadd.f32 %v1950_v60, %v1902_v41 }
 0x1fa   :  { %v2008_v21 = vrot.slane %v2007_v35, 2  ;;  %2085 = vrot.lane.b32.xlu2 %v3658_v1, %s2822_s21  ;;  %v1541_v17 = vmax.f32 %v1539_v16, %v1540_v14 }
 0x1fb   :  { %v2012_v34 = vsel %vm1965_vm15, %v1951_v23, -inf }
 0x1fc   :  { %v2009_v20 = vmax.f32 %v2007_v35, %v2008_v21  ;;  %v1542_v40 = vrot.slane %v1541_v17, 4 }
 0x1fe   :  { %v1903_v27 = vpop.f32.mrf.mxu2  ;;  %v2010_v33 = vrot.slane %v2009_v20, 1  ;;  %v1543_v24 = vmax.f32 %v1541_v17, %v1542_v40  ;;  %v1482_v10 = vpop.f32.mrf.mxu0 }
 0x1ff   :  { %v1952_v56 = vpop.f32.mrf.mxu3  ;;  %v1904_v18 = vadd.f32 %v1903_v27, %v1854_v25  ;;  %v1857_v43 = vpop.f32.mrf.mxu1  ;;  %v1483_v13 = vadd.f32 %v1482_v10, %v3571_v51 }
 0x200   :  { %v3672_v28 = vmax.f32 %v2009_v20, %v2010_v33  ;;  %v1544_v26 = vrot.slane %v1543_v24, 2 }
 0x201   :  { %v1953_v61 = vadd.f32 %v1952_v56, %v1904_v18  ;;  %v1548_v31 = vsel %vm1492_vm12, %v1483_v13, -inf }
 0x202   :  { %1582 = vrot.lane.b32.xlu2 %v3670_v52, %s2821_s4  ;;  %2055 = vrot.lane.b32.xlu0 %v3672_v28, %s2821_s4  ;;  %v1545_v36 = vmax.f32 %v1543_v24, %v1544_v26 }
 0x203   :  { %v2013_v47 = vsel %vm1967_vm0, %v1953_v61, -inf }
 0x204   :  { %v2014_v22 = vmax.f32 %v2012_v34, %v2013_v47  ;;  %v1546_v42 = vrot.slane %v1545_v36, 1 }
 0x206   :  { %v2015_v6 = vrot.slane %v2014_v22, 4  ;;  %v1906_v5 = vpop.f32.mrf.mxu2  ;;  %v1484_v4 = vpop.f32.mrf.mxu0  ;;  %v3681_v46 = vmax.f32 %v1545_v36, %v1546_v42 }
 0x207   :  { %v1955_v2 = vpop.f32.mrf.mxu3  ;;  %v1485_v57 = vadd.f32 %v1484_v4, %v3577_v58  ;;  %v1859_v0 = vpop.f32.mrf.mxu1  ;;  %v1907_v51 = vadd.f32 %v1906_v5, %v1857_v43 }
 0x208   :  { %v2016_v54 = vmax.f32 %v2014_v22, %v2015_v6 }
 0x209   :  { %v1549_v32 = vsel %vm1494_vm13, %v1485_v57, -inf  ;;  %v1956_v58 = vadd.f32 %v1955_v2, %v1907_v51 }
 0x20a   :  { %v2017_v19 = vrot.slane %v2016_v54, 2  ;;  %2087 = vrot.lane.b32.xlu2 %v3672_v28, %s2822_s21  ;;  %1584 = vrot.lane.b32.xlu0 %v3681_v46, %s2821_s4  ;;  %v1550_v63 = vmax.f32 %v1548_v31, %v1549_v32 }
 0x20b   :  { %v2021_v15 = vsel %vm1965_vm15, %v1956_v58, -inf }
 0x20c   :  { %v2018_v8 = vmax.f32 %v2016_v54, %v2017_v19  ;;  %v1551_v9 = vrot.slane %v1550_v63, 4 }
 0x20e   :  { %v1908_v7 = vpop.f32.mrf.mxu2  ;;  %v2019_v44 = vrot.slane %v2018_v8, 1  ;;  %v1552_v29 = vmax.f32 %v1550_v63, %v1551_v9  ;;  %v1487_v60 = vpop.f32.mrf.mxu0 }
 0x20f   :  { %v1957_v11 = vpop.f32.mrf.mxu3  ;;  %v1909_v30 = vadd.f32 %v1908_v7, %v1859_v0  ;;  %v1862_v14 = vpop.f32.mrf.mxu1  ;;  %v1488_v50 = vadd.f32 %v1487_v60, %v3585_v55 }
 0x210   :  { %v3690_v48 = vmax.f32 %v2018_v8, %v2019_v44  ;;  %v1553_v25 = vrot.slane %v1552_v29, 2 }
 0x211   :  { %v1958_v35 = vadd.f32 %v1957_v11, %v1909_v30  ;;  %v1557_v18 = vsel %vm1492_vm12, %v1488_v50, -inf }
 0x212   :  { %2089 = vrot.lane.b32.xlu2 %v3690_v48, %s2822_s21  ;;  %2057 = vrot.lane.b32.xlu0 %v3690_v48, %s2821_s4  ;;  %v1554_v21 = vmax.f32 %v1552_v29, %v1553_v25 }
 0x213   :  { %v2022_v12 = vsel %vm1967_vm0, %v1958_v35, -inf }
 0x214   :  { %v2023_v16 = vmax.f32 %v2021_v15, %v2022_v12  ;;  %v1555_v41 = vrot.slane %v1554_v21, 1 }
 0x216   :  { %v2024_v17 = vrot.slane %v2023_v16, 4  ;;  %v1911_v20 = vpop.f32.mrf.mxu2  ;;  %v1489_v27 = vpop.f32.mrf.mxu0  ;;  %v3699_v56 = vmax.f32 %v1554_v21, %v1555_v41 }
 0x217   :  { %v1960_v40 = vpop.f32.mrf.mxu3  ;;  %v1490_v23 = vadd.f32 %v1489_v27, %v3590_v62  ;;  %v1912_v43 = vadd.f32 %v1911_v20, %v1862_v14  ;;  %v1864_v34 = vpop.f32.mrf.mxu1  ;;  %v2791_v27 = vld [vmem:[%s3811_s5] ss:$0 sm:$0xff] }
 0x218   :  { %v2025_v33 = vmax.f32 %v2023_v16, %v2024_v17 }
 0x219   :  { %v1558_v10 = vsel %vm1494_vm13, %v1490_v23, -inf  ;;  %v1961_v22 = vadd.f32 %v1960_v40, %v1912_v43  ;;  %v2218_v40 = vld [vmem:[%s3813_s7 + $0x28] sm:$0xff] }
 0x21a   :  { %v2026_v24 = vrot.slane %v2025_v33, 2  ;;  %1586 = vrot.lane.b32.xlu0 %v3699_v56, %s2821_s4  ;;  %v1559_v26 = vmax.f32 %v1557_v18, %v1558_v10  ;;  %2236 = vmatpush.msrb.mxu0 %v2218_v40 }
 0x21b   :  { %v2030_v4 = vsel %vm1965_vm15, %v1961_v22, -inf }
 0x21c   :  { %v2027_v61 = vmax.f32 %v2025_v33, %v2026_v24  ;;  %v1560_v55 = vrot.slane %v1559_v26, 4  ;;  %v3724_v58 = vpop.permute.xlu2 %2047 }
 0x21e   :  { %v1913_v47 = vpop.f32.mrf.mxu2  ;;  %v2028_v36 = vrot.slane %v2027_v61, 1  ;;  %v1561_v42 = vmax.f32 %v1559_v26, %v1560_v55 }
 0x21f   :  { %v1914_v6 = vadd.f32 %v1913_v47, %v1864_v34  ;;  %v1962_v13 = vpop.f32.mrf.mxu3 }
 0x220   :  { %v3706_v62 = vmax.f32 %v2027_v61, %v2028_v36  ;;  %v1562_v5 = vrot.slane %v1561_v42, 2 }
 0x221   :  { %v1963_v2 = vadd.f32 %v1962_v13, %v1914_v6  ;;  %v2215_v13 = vld [vmem:[%s3813_s7 + $0x10] sm:$0xff] }
 0x222   :  { %2059 = vrot.lane.b32.xlu1 %v3706_v62, %s2821_s4  ;;  %v1563_v57 = vmax.f32 %v1561_v42, %v1562_v5 }
 0x223   :  { %v2031_v54 = vsel %vm1967_vm0, %v1963_v2, -inf }
 0x224   :  { %v2032_v19 = vmax.f32 %v2030_v4, %v2031_v54  ;;  %v1564_v31 = vrot.slane %v1563_v57, 1 }
 0x226   :  { %v2033_v32 = vrot.slane %v2032_v19, 4  ;;  %v3712_v0 = vmax.f32 %v1563_v57, %v1564_v31 }
 0x228   :  { %v2034_v51 = vmax.f32 %v2032_v19, %v2033_v32  ;;  %1588 = vrot.lane.b32.xlu0 %v3712_v0, %s2821_s4  ;;  %v2214_v19 = vld [vmem:[%s3813_s7 + $0x8] sm:$0xff] }
 0x22a   :  { %v2035_v63 = vrot.slane %v2034_v51, 2  ;;  %v1575_v60 = vpop.permute.xlu1 %1574 }
 0x22b   :  { %v1598_v10 = vmax.f32 %v3603_v3, %v1575_v60  ;;  %v2216_v3 = vld [vmem:[%s3813_s7 + $0x18] sm:$0xff] }
 0x22c   :  { %v2036_v8 = vmax.f32 %v2034_v51, %v2035_v63 }
 0x22d   :  { %v1610_v36 = vadd.f32 %v2791_v27, %v1598_v10 }
 0x22e   :  { %v2037_v9 = vrot.slane %v2036_v8, 1 }
 0x22f   :  { %v1618_v5 = vmax.f32 %v1610_v36, 0.0 }
 0x230   :  { %v3716_v7 = vmax.f32 %v2036_v8, %v2037_v9 }
 0x232   :  { %2093 = vrot.lane.b32.xlu2 %v3716_v7, %s2822_s21  ;;  %2061 = vrot.lane.b32.xlu1 %v3716_v7, %s2821_s4 }
 0x234   :  { %v3730_v15 = vpop.permute.xlu1 %2079 }
 0x23a   :  { %2091 = vrot.lane.b32.xlu1 %v3706_v62, %s2822_s21  ;;  %v1577_v11 = vpop.permute.xlu0 %1576 }
 0x23b   :  { %v1599_v50 = vmax.f32 %v3619_v45, %v1577_v11 }
 0x23d   :  { %v1611_v33 = vadd.f32 %v2791_v27, %v1599_v50 }
 0x23f   :  { %v1619_v26 = vmax.f32 %v1611_v33, 0.0 }
 0x242   :  { %v1581_v30 = vpop.permute.xlu2 %1580 }
 0x243   :  { %v1601_v45 = vmax.f32 %v3649_v37, %v1581_v30  ;;  %v2169_v37 = vrot.slane %v1619_v26, 7  ;;  %v2213_v30 = vld [vmem:[%s3813_s7] sm:$0xff] }
 0x244   :  { %v2050_v44 = vpop.permute.xlu0 %2049 }
 0x245   :  { %v1613_v22 = vadd.f32 %v2791_v27, %v1601_v45  ;;  %v2170_v31 = vsel %vm2140_vm6, %v2169_v37, %v1618_v5  ;;  %v2072_v32 = vmax.f32 %v3626_v38, %v2050_v44 }
 0x247   :  { %v1621_v2 = vmax.f32 %v1613_v22, 0.0 }
 0x249   :  { %v2173_v60 = vrot.slane %v1621_v2, 5 }
 0x24a   :  { %v1579_v21 = vpop.permute.xlu1 %1578 }
 0x24b   :  { %v1600_v20 = vmax.f32 %v3633_v59, %v1579_v21 }
 0x24c   :  { %v2082_v29 = vpop.permute.xlu0 %2081  ;;  %v3728_v35 = vpop.permute.xlu2 %2053 }
 0x24d   :  { %v1612_v24 = vadd.f32 %v2791_v27, %v1600_v20 }
 0x24f   :  { %v1620_v55 = vmax.f32 %v1612_v24, 0.0 }
 0x254   :  { %v3732_v16 = vpop.permute.xlu2 %2085  ;;  %v2052_v41 = vpop.permute.xlu1 %2051 }
 0x255   :  { %v2073_v9 = vmax.f32 %v3642_v39, %v2052_v41  ;;  %v2792_v39 = vld [vmem:[%s3812_s6] ss:$0 sm:$0xff]  ;;  %s2823_s6 = smov 16  }
 0x25c   :  { %v1583_v17 = vpop.permute.xlu2 %1582  ;;  %v2084_v61 = vpop.permute.xlu1 %2083 }
 0x25d   :  { %v1602_v18 = vmax.f32 %v3670_v52, %v1583_v17  ;;  %v2217_v52 = vld [vmem:[%s3813_s7 + $0x20] sm:$0xff]  ;;  %v2105_v50 = vmax.f32 %v2073_v9, %v2084_v61  ;;  %s2824_s7 = smov 32  }
 0x25e   :  { %2237 = vmatpush.msrb.mxu0 %v2217_v52 }
 0x25f   :  { %v1614_v34 = vadd.f32 %v2791_v27, %v1602_v18  ;;  %v2117_v24 = vadd.f32 %v2792_v39, %v2105_v50 }
 0x260   :  { %2238 = vmatpush.msrb.mxu0 %v2216_v3 }
 0x262   :  { %2239 = vmatpush.msrb.mxu0 %v2215_v13 }
 0x264   :  { %v2088_v47 = vpop.permute.xlu2 %2087  ;;  %2240 = vmatpush.msrb.mxu0 %v2214_v19 }
 0x266   :  { %2241 = vmatpush.msrb.mxu0 %v2213_v30 }
 0x26c   :  { %v2090_v38 = vpop.permute.xlu2 %2089 }
 0x274   :  { %v3726_v25 = vpop.permute.xlu0 %2055 }
 0x27c   :  { %v1585_v12 = vpop.permute.xlu0 %1584 }
 0x27d   :  { %v1603_v59 = vmax.f32 %v3681_v46, %v1585_v12  ;;  %v2171_v46 = vrot.slane %v1620_v55, 6  ;;  %v2104_v12 = vmax.f32 %v2072_v32, %v2082_v29  ;;  %v2071_v29 = vmax.f32 %v3610_v53, %v3724_v58 }
 0x27f   :  { %v1615_v42 = vadd.f32 %v2791_v27, %v1603_v59  ;;  %v2172_v8 = vsel %vm2143_vm7, %v2171_v46, %v2170_v31  ;;  %v2116_v33 = vadd.f32 %v2792_v39, %v2104_v12  ;;  %v2793_v12 = vld [vmem:[%s3814_s8] ss:$0 sm:$0xff] }
 0x280   :  { %v2174_v41 = vsel %vm2146_vm8, %v2173_v60, %v2172_v8 }
 0x281   :  { %v1623_v4 = vmax.f32 %v1615_v42, 0.0 }
 0x283   :  { %v2177_v21 = vrot.slane %v1623_v4, 3 }
 0x284   :  { %v3734_v14 = vpop.permute.xlu0 %2057 }
 0x285   :  { %v2076_v20 = vmax.f32 %v3690_v48, %v3734_v14  ;;  %v2103_v48 = vmax.f32 %v2071_v29, %v3730_v15 }
 0x287   :  { %v2108_v45 = vmax.f32 %v2076_v20, %v2090_v38  ;;  %v2115_v61 = vadd.f32 %v2792_v39, %v2103_v48 }
 0x289   :  { %v2123_v42 = vmax.f32 %v2115_v61, 0.0 }
 0x28c   :  { %v1587_v23 = vpop.permute.xlu0 %1586  ;;  %v2094_v26 = vpop.permute.xlu2 %2093 }
 0x28d   :  { %v1604_v43 = vmax.f32 %v3699_v56, %v1587_v23  ;;  %v1622_v56 = vmax.f32 %v1614_v34, 0.0  ;;  %v2120_v34 = vadd.f32 %v2792_v39, %v2108_v45 }
 0x28f   :  { %v1616_v6 = vadd.f32 %v2791_v27, %v1604_v43  ;;  %v2175_v11 = vrot.slane %v1622_v56, 4  ;;  %v2128_v52 = vmax.f32 %v2120_v34, 0.0 }
 0x291   :  { %v1624_v54 = vmax.f32 %v1616_v6, 0.0  ;;  %v2202_v4 = vrot.slane %v2128_v52, 3 }
 0x293   :  { %v2179_v44 = vrot.slane %v1624_v54, 2 }
 0x294   :  { %v2060_v51 = vpop.permute.xlu1 %2059 }
 0x29a   :  { %v1589_v57 = vpop.permute.xlu0 %1588 }
 0x29b   :  { %v1605_v63 = vmax.f32 %v3712_v0, %v1589_v57  ;;  %v2075_v0 = vmax.f32 %v3672_v28, %v3726_v25  ;;  %v2074_v28 = vmax.f32 %v3658_v1, %v3728_v35  ;;  %v2124_v1 = vmax.f32 %v2116_v33, 0.0 }
 0x29c   :  { %v2125_v35 = vmax.f32 %v2117_v24, 0.0 }
 0x29d   :  { %v1617_v17 = vadd.f32 %v2791_v27, %v1605_v63  ;;  %v2176_v27 = vsel %vm2149_vm9, %v2175_v11, %v2174_v41  ;;  %v2107_v18 = vmax.f32 %v2075_v0, %v2088_v47  ;;  %v2106_v14 = vmax.f32 %v2074_v28, %v3732_v16 }
 0x29e   :  { %v2178_v23 = vsel %vm2152_vm10, %v2177_v21, %v2176_v27  ;;  %v2194_v36 = vrot.slane %v2124_v1, 7  ;;  %v2196_v15 = vrot.slane %v2125_v35, 6  ;;  %v2077_v16 = vmax.f32 %v3706_v62, %v2060_v51 }
 0x29f   :  { %v1625_v40 = vmax.f32 %v1617_v17, 0.0  ;;  %v2180_v10 = vsel %vm2155_vm11, %v2179_v44, %v2178_v23  ;;  %v2119_v43 = vadd.f32 %v2792_v39, %v2107_v18  ;;  %v2118_v55 = vadd.f32 %v2792_v39, %v2106_v14 }
 0x2a0   :  { %v2195_v46 = vsel %vm2140_vm6, %v2194_v36, %v2123_v42 }
 0x2a1   :  { %v2181_v25 = vrot.slane %v1625_v40, 1  ;;  %v2127_v22 = vmax.f32 %v2119_v43, 0.0  ;;  %v2126_v6 = vmax.f32 %v2118_v55, 0.0  ;;  %v2197_v56 = vsel %vm2143_vm7, %v2196_v15, %v2195_v46 }
 0x2a3   :  { %v2182_v53 = vsel %vm2158_vm14, %v2181_v25, %v2180_v10  ;;  %v2200_v13 = vrot.slane %v2127_v22, 4  ;;  %v2198_v2 = vrot.slane %v2126_v6, 5 }
 0x2a4   :  { %v2062_v59 = vpop.permute.xlu1 %2061  ;;  %2183 = vrot.lane.b32.xlu0 %v2182_v53, %s2823_s6 }
 0x2a5   :  { %v2078_v58 = vmax.f32 %v3716_v7, %v2062_v59  ;;  %v2199_v19 = vsel %vm2146_vm8, %v2198_v2, %v2197_v56 }
 0x2a6   :  { %v2201_v62 = vsel %vm2149_vm9, %v2200_v13, %v2199_v19 }
 0x2a7   :  { %v2110_v47 = vmax.f32 %v2078_v58, %v2094_v26  ;;  %v2203_v51 = vsel %vm2152_vm10, %v2202_v4, %v2201_v62 }
 0x2a9   :  { %v2122_v3 = vadd.f32 %v2792_v39, %v2110_v47 }
 0x2ab   :  { %v2130_v54 = vmax.f32 %v2122_v3, 0.0 }
 0x2ac   :  { %v2092_v7 = vpop.permute.xlu1 %2091 }
 0x2ad   :  { %v2109_v37 = vmax.f32 %v2077_v16, %v2092_v7  ;;  %v2206_v32 = vrot.slane %v2130_v54, 1 }
 0x2af   :  { %v2121_v5 = vadd.f32 %v2792_v39, %v2109_v37 }
 0x2b1   :  { %v2129_v57 = vmax.f32 %v2121_v5, 0.0 }
 0x2b3   :  { %v2204_v31 = vrot.slane %v2129_v57, 2 }
 0x2b5   :  { %v2205_v63 = vsel %vm2155_vm11, %v2204_v31, %v2203_v51 }
 0x2b6   :  { %v2207_v8 = vsel %vm2158_vm14, %v2206_v32, %v2205_v63 }
 0x2b7   :  { %2208 = vrot.lane.b32.xlu1 %v2207_v8, %s2824_s7 }
 0x316   :  { %v2184_v9 = vpop.permute.xlu0 %2183 }
 0x317   :  { %v2211_v11 = vsel %vm946_vm4, %v3598_v49, %v2184_v9 }
 0x329   :  { %v2209_v30 = vpop.permute.xlu1 %2208 }
 0x32a   :  { %v2212_v60 = vsel %vm1492_vm12, %v2211_v11, %v2209_v30 }
 0x32b   :  { %2680 = vmatmul.msk.f32.vlgmr.msrb.gmra.mxu0 %vm1965_vm15, %v2212_v60 }
 0x3a8   :  { %v2243_v21 = vpop.f32.mrf.mxu0 }
 0x3a9   :  { %v2244_v17 = vadd.f32 %v2793_v12, %v2243_v21 }
 0x3ab   :  { %2247 = vst.msk [vmem:[#allocation2] sm:$0xff] %vm2246_vm1, %v2244_v17 }
 0x3ac   :  { %2258 = dma.vmem_to_hbm [thread:$0]  %s2254_s18, 128, %s2256_s3, [#allocation3]  }
 0x3ad   :  { %2819 = dma.done.wait [#allocation3], 128  }
 0x3ae   :  { %2820 = vsyncadd [#allocation3], 4294967168 }
 0x3af   :  { %2263 = vsyncpa [#allocation3], 1 }

</bundles_post_ra>
